<compile_context>
chip_gen: v6e
topology: v6e:2x2x1
jax: 0.10.0
libtpu: 0.0.40
codegen_flags: <defaults>
</compile_context>

<pallas_src>
import functools

import jax
import jax.numpy as jnp
from jax.experimental import pallas as pl
from jax.experimental.pallas import tpu as pltpu


def _tree_sum(vals):
    """Pairwise (balanced) sum -> independent VALU chains instead of one."""
    vals = list(vals)
    while len(vals) > 1:
        nxt = [vals[i] + vals[i + 1] for i in range(0, len(vals) - 1, 2)]
        if len(vals) % 2:
            nxt.append(vals[-1])
        vals = nxt
    return vals[0]


def _resblock_kernel(x_ref, w1_ref, b1_ref, w2_ref, b2_ref, o_ref, *,
                     H, W, K, C, res_scale):
    P = K // 2
    HW = H * W
    PAD = P * (W + 1)                      # covers max |shift| = P*W + P

    x2d = x_ref[0]                          # (C, HW) f32

    # Column-validity masks: the only boundary condition the flattened-lane
    # shift does not already turn into zeros via the lane padding.
    lane = jax.lax.broadcasted_iota(jnp.int32, (1, HW), 1)
    wpos = lane % W
    col_mask = {dw: jnp.logical_and(wpos + dw >= 0, wpos + dw < W)
                for dw in range(-P, P + 1) if dw != 0}

    # Read weights / biases exactly once (values, not repeated ref reads).
    w1 = w1_ref[...]                        # (Cout, K*K*Cin)
    w2 = w2_ref[...]
    b1 = b1_ref[...]                        # (C, 1)
    b2 = b2_ref[...]

    zpad = jnp.zeros((C, PAD), jnp.float32)

    def conv3x3(src2d, wmat, bias):
        # SAME conv on a (C, HW) slab: 9 shifted lane-slices of a zero-lane-
        # padded copy, each contracted over Cin with VPU broadcast-FMA.
        xp = jnp.concatenate([zpad, src2d, zpad], axis=1)   # (C, PAD+HW+PAD)
        parts = []
        for kh in range(K):
            dh = kh - P
            for kw in range(K):
                dw = kw - P
                s = dh * W + dw
                sh = xp[:, PAD + s: PAD + s + HW]            # (C, HW)
                if dw != 0:
                    sh = jnp.where(col_mask[dw], sh, 0.0)
                j0 = (kh * K + kw) * C
                terms = [wmat[:, j0 + ci: j0 + ci + 1] * sh[ci:ci + 1, :]
                         for ci in range(C)]
                parts.append(_tree_sum(terms))
        return _tree_sum(parts) + bias

    a1 = jnp.maximum(conv3x3(x2d, w1, b1), 0.0)              # conv1 + ReLU
    a2 = conv3x3(a1, w2, b2)                                  # conv2
    o_ref[0] = (a2 * res_scale + x2d).astype(o_ref.dtype)     # residual


def resblock_forward(x_nchw, w1, b1, w2, b2, res_scale=1.0):
    """x_nchw: (N, C, H, W); w*: (Cout, Cin, K, K) PyTorch layout; b*: (C,)."""
    N, C, H, W = x_nchw.shape
    K = w1.shape[-1]
    HW = H * W

    # Pure layout plumbing: reshapes only (no activation transposes, no pad).
    x = x_nchw.reshape(N, C, HW).astype(jnp.float32)
    # (Cout, Cin, K, K) -> (Cout, K, K, Cin) -> (Cout, K*K*Cin); index
    # (kh*K + kw)*Cin + ci.  Weight tensors are tiny (4x4x3x3).
    w1k = jnp.transpose(w1, (0, 2, 3, 1)).reshape(C, K * K * C).astype(jnp.float32)
    w2k = jnp.transpose(w2, (0, 2, 3, 1)).reshape(C, K * K * C).astype(jnp.float32)
    b1k = b1.reshape(C, 1).astype(jnp.float32)
    b2k = b2.reshape(C, 1).astype(jnp.float32)

    kernel = functools.partial(_resblock_kernel, H=H, W=W, K=K, C=C,
                               res_scale=float(res_scale))

    out = pl.pallas_call(
        kernel,
        out_shape=jax.ShapeDtypeStruct((N, C, HW), jnp.float32),
        grid_spec=pltpu.PrefetchScalarGridSpec(
            num_scalar_prefetch=0,
            grid=(N,),                      # one image per step / per TC (v7x)
            in_specs=[
                pl.BlockSpec((1, C, HW), lambda n: (n, 0, 0)),
                pl.BlockSpec((C, K * K * C), lambda n: (0, 0)),
                pl.BlockSpec((C, 1), lambda n: (0, 0)),
                pl.BlockSpec((C, K * K * C), lambda n: (0, 0)),
                pl.BlockSpec((C, 1), lambda n: (0, 0)),
            ],
            out_specs=pl.BlockSpec((1, C, HW), lambda n: (n, 0, 0)),
        ),
        compiler_params=pltpu.CompilerParams(
            dimension_semantics=("parallel",)),
    )(x, w1k, b1k, w2k, b2k)

    return out.reshape(N, C, H, W)


def _reference_resblock(x, w1, b1, w2, b2, res_scale):
    dn = ('NCHW', 'OIHW', 'NCHW')
    y = jax.lax.conv_general_dilated(x, w1, (1, 1), 'SAME', dimension_numbers=dn)
    y = y + b1[None, :, None, None]
    y = jnp.maximum(y, 0.0)
    y = jax.lax.conv_general_dilated(y, w2, (1, 1), 'SAME', dimension_numbers=dn)
    y = y + b2[None, :, None, None]
    return y * res_scale + x


if __name__ == "__main__":
    # ResBlock(n_feats=4, kernel_size=3, res_scale=1)
    n_feats, kernel_size, res_scale = 4, 3, 1.0
    N, H, W = 2, 16, 16

    key = jax.random.PRNGKey(0)
    kx, kw1, kb1, kw2, kb2 = jax.random.split(key, 5)

    x = jax.random.normal(kx, (N, n_feats, H, W), jnp.float32)
    w1 = 0.1 * jax.random.normal(kw1, (n_feats, n_feats, kernel_size, kernel_size), jnp.float32)
    b1 = 0.1 * jax.random.normal(kb1, (n_feats,), jnp.float32)
    w2 = 0.1 * jax.random.normal(kw2, (n_feats, n_feats, kernel_size, kernel_size), jnp.float32)
    b2 = 0.1 * jax.random.normal(kb2, (n_feats,), jnp.float32)

    out = resblock_forward(x, w1, b1, w2, b2, res_scale)
    out = jax.block_until_ready(out)

    ref = _reference_resblock(x, w1, b1, w2, b2, res_scale)
    assert out.shape == x.shape and out.dtype == x.dtype
    assert jnp.allclose(out, ref, atol=1e-4, rtol=1e-4), "mismatch vs reference"

    print("KERNEL_OK")
</pallas_src>

<mosaic_0001>
module attributes {stable_mosaic.version = 11 : i64} {
  func.func @_resblock_kernel(%arg0: i32, %arg1: memref<1x4x256xf32, #tpu.memory_space<vmem>>, %arg2: memref<4x36xf32, #tpu.memory_space<vmem>>, %arg3: memref<4x1xf32, #tpu.memory_space<vmem>>, %arg4: memref<4x36xf32, #tpu.memory_space<vmem>>, %arg5: memref<4x1xf32, #tpu.memory_space<vmem>>, %arg6: memref<1x4x256xf32, #tpu.memory_space<vmem>>) attributes {dimension_semantics = [#tpu.dimension_semantics<parallel>], iteration_bounds = array<i64: 2>, scalar_prefetch = 0 : i64, scratch_operands = 0 : i64, tpu.core_type = #tpu.core_type<tc>, window_params = [{transform_indices = @transform_0, window_bounds = array<i64: 1, 4, 256>}, {pipeline_mode = #tpu.pipeline_mode<synchronous>, transform_indices = @transform_1, window_bounds = array<i64: 4, 36>}, {pipeline_mode = #tpu.pipeline_mode<synchronous>, transform_indices = @transform_2, window_bounds = array<i64: 4, 1>}, {pipeline_mode = #tpu.pipeline_mode<synchronous>, transform_indices = @transform_3, window_bounds = array<i64: 4, 36>}, {pipeline_mode = #tpu.pipeline_mode<synchronous>, transform_indices = @transform_4, window_bounds = array<i64: 4, 1>}, {transform_indices = @transform_5, window_bounds = array<i64: 1, 4, 256>}]} {
    %c0 = arith.constant 0 : index
    %c0_0 = arith.constant 0 : index
    %c0_1 = arith.constant 0 : index
    %0 = vector.load %arg1[%c0, %c0_0, %c0_1] : memref<1x4x256xf32, #tpu.memory_space<vmem>>, vector<1x4x256xf32>
    %1 = vector.shape_cast %0 : vector<1x4x256xf32> to vector<4x256xf32>
    %2 = tpu.iota {dimensions = array<i32: 1>} : vector<1x256xi32>
    %c16_i32 = arith.constant 16 : i32
    %c0_i32 = arith.constant 0 : i32
    %3 = arith.cmpi eq, %c16_i32, %c0_i32 : i32
    %c1_i32 = arith.constant 1 : i32
    %4 = arith.select %3, %c1_i32, %c16_i32 : i32
    %5 = vector.broadcast %4 : i32 to vector<1x256xi32>
    %6 = arith.remsi %2, %5 : vector<1x256xi32>
    %c0_i32_2 = arith.constant 0 : i32
    %7 = vector.broadcast %c0_i32_2 : i32 to vector<1x256xi32>
    %8 = arith.cmpi ne, %6, %7 : vector<1x256xi32>
    %c0_i32_3 = arith.constant 0 : i32
    %9 = vector.broadcast %c0_i32_3 : i32 to vector<1x256xi32>
    %10 = arith.cmpi slt, %6, %9 : vector<1x256xi32>
    %c0_i32_4 = arith.constant 0 : i32
    %11 = arith.cmpi slt, %4, %c0_i32_4 : i32
    %12 = vector.broadcast %11 : i1 to vector<1x256xi1>
    %13 = vector.broadcast %12 : vector<1x256xi1> to vector<1x256xi1>
    %14 = arith.xori %10, %13 : vector<1x256xi1>
    %15 = arith.andi %14, %8 : vector<1x256xi1>
    %16 = vector.broadcast %4 : i32 to vector<1x256xi32>
    %17 = arith.addi %6, %16 : vector<1x256xi32>
    %18 = arith.select %15, %17, %6 : vector<1x256xi1>, vector<1x256xi32>
    %c-1_i32 = arith.constant -1 : i32
    %19 = vector.broadcast %c-1_i32 : i32 to vector<1x256xi32>
    %20 = arith.addi %18, %19 : vector<1x256xi32>
    %c0_i32_5 = arith.constant 0 : i32
    %21 = vector.broadcast %c0_i32_5 : i32 to vector<1x256xi32>
    %22 = arith.cmpi sge, %20, %21 : vector<1x256xi32>
    %c-1_i32_6 = arith.constant -1 : i32
    %23 = vector.broadcast %c-1_i32_6 : i32 to vector<1x256xi32>
    %24 = arith.addi %18, %23 : vector<1x256xi32>
    %c16_i32_7 = arith.constant 16 : i32
    %25 = vector.broadcast %c16_i32_7 : i32 to vector<1x256xi32>
    %26 = arith.cmpi slt, %24, %25 : vector<1x256xi32>
    %27 = arith.andi %22, %26 : vector<1x256xi1>
    %c1_i32_8 = arith.constant 1 : i32
    %28 = vector.broadcast %c1_i32_8 : i32 to vector<1x256xi32>
    %29 = arith.addi %18, %28 : vector<1x256xi32>
    %c0_i32_9 = arith.constant 0 : i32
    %30 = vector.broadcast %c0_i32_9 : i32 to vector<1x256xi32>
    %31 = arith.cmpi sge, %29, %30 : vector<1x256xi32>
    %c1_i32_10 = arith.constant 1 : i32
    %32 = vector.broadcast %c1_i32_10 : i32 to vector<1x256xi32>
    %33 = arith.addi %18, %32 : vector<1x256xi32>
    %c16_i32_11 = arith.constant 16 : i32
    %34 = vector.broadcast %c16_i32_11 : i32 to vector<1x256xi32>
    %35 = arith.cmpi slt, %33, %34 : vector<1x256xi32>
    %36 = arith.andi %31, %35 : vector<1x256xi1>
    %c0_12 = arith.constant 0 : index
    %c0_13 = arith.constant 0 : index
    %37 = vector.load %arg2[%c0_12, %c0_13] : memref<4x36xf32, #tpu.memory_space<vmem>>, vector<4x36xf32>
    %c0_14 = arith.constant 0 : index
    %c0_15 = arith.constant 0 : index
    %38 = vector.load %arg4[%c0_14, %c0_15] : memref<4x36xf32, #tpu.memory_space<vmem>>, vector<4x36xf32>
    %c0_16 = arith.constant 0 : index
    %c0_17 = arith.constant 0 : index
    %39 = vector.load %arg3[%c0_16, %c0_17] : memref<4x1xf32, #tpu.memory_space<vmem>>, vector<4x1xf32>
    %c0_18 = arith.constant 0 : index
    %c0_19 = arith.constant 0 : index
    %40 = vector.load %arg5[%c0_18, %c0_19] : memref<4x1xf32, #tpu.memory_space<vmem>>, vector<4x1xf32>
    %cst = arith.constant 0.000000e+00 : f32
    %41 = vector.broadcast %cst : f32 to vector<4x17xf32>
    %42 = tpu.concatenate %41, %1, %41 in 1 : vector<4x17xf32>, vector<4x256xf32>, vector<4x17xf32> -> vector<4x290xf32>
    %43 = vector.extract_strided_slice %42 {offsets = [0, 0], sizes = [4, 256], strides = [1, 1]} : vector<4x290xf32> to vector<4x256xf32>
    %cst_20 = arith.constant 0.000000e+00 : f32
    %44 = vector.shape_cast %27 : vector<1x256xi1> to vector<1x256xi1>
    %45 = vector.broadcast %44 : vector<1x256xi1> to vector<4x256xi1>
    %46 = vector.broadcast %cst_20 : f32 to vector<4x256xf32>
    %47 = arith.select %45, %43, %46 : vector<4x256xi1>, vector<4x256xf32>
    %48 = vector.extract_strided_slice %37 {offsets = [0, 0], sizes = [4, 1], strides = [1, 1]} : vector<4x36xf32> to vector<4x1xf32>
    %49 = vector.extract_strided_slice %47 {offsets = [0, 0], sizes = [1, 256], strides = [1, 1]} : vector<4x256xf32> to vector<1x256xf32>
    %50 = vector.broadcast %48 : vector<4x1xf32> to vector<4x256xf32>
    %51 = vector.broadcast %49 : vector<1x256xf32> to vector<4x256xf32>
    %52 = arith.mulf %50, %51 : vector<4x256xf32>
    %53 = vector.extract_strided_slice %37 {offsets = [0, 1], sizes = [4, 1], strides = [1, 1]} : vector<4x36xf32> to vector<4x1xf32>
    %54 = vector.extract_strided_slice %47 {offsets = [1, 0], sizes = [1, 256], strides = [1, 1]} : vector<4x256xf32> to vector<1x256xf32>
    %55 = vector.broadcast %53 : vector<4x1xf32> to vector<4x256xf32>
    %56 = vector.broadcast %54 : vector<1x256xf32> to vector<4x256xf32>
    %57 = arith.mulf %55, %56 : vector<4x256xf32>
    %58 = vector.extract_strided_slice %37 {offsets = [0, 2], sizes = [4, 1], strides = [1, 1]} : vector<4x36xf32> to vector<4x1xf32>
    %59 = vector.extract_strided_slice %47 {offsets = [2, 0], sizes = [1, 256], strides = [1, 1]} : vector<4x256xf32> to vector<1x256xf32>
    %60 = vector.broadcast %58 : vector<4x1xf32> to vector<4x256xf32>
    %61 = vector.broadcast %59 : vector<1x256xf32> to vector<4x256xf32>
    %62 = arith.mulf %60, %61 : vector<4x256xf32>
    %63 = vector.extract_strided_slice %37 {offsets = [0, 3], sizes = [4, 1], strides = [1, 1]} : vector<4x36xf32> to vector<4x1xf32>
    %64 = vector.extract_strided_slice %47 {offsets = [3, 0], sizes = [1, 256], strides = [1, 1]} : vector<4x256xf32> to vector<1x256xf32>
    %65 = vector.broadcast %63 : vector<4x1xf32> to vector<4x256xf32>
    %66 = vector.broadcast %64 : vector<1x256xf32> to vector<4x256xf32>
    %67 = arith.mulf %65, %66 : vector<4x256xf32>
    %68 = arith.addf %52, %57 : vector<4x256xf32>
    %69 = arith.addf %62, %67 : vector<4x256xf32>
    %70 = arith.addf %68, %69 : vector<4x256xf32>
    %71 = vector.extract_strided_slice %42 {offsets = [0, 1], sizes = [4, 256], strides = [1, 1]} : vector<4x290xf32> to vector<4x256xf32>
    %72 = vector.extract_strided_slice %37 {offsets = [0, 4], sizes = [4, 1], strides = [1, 1]} : vector<4x36xf32> to vector<4x1xf32>
    %73 = vector.extract_strided_slice %71 {offsets = [0, 0], sizes = [1, 256], strides = [1, 1]} : vector<4x256xf32> to vector<1x256xf32>
    %74 = vector.broadcast %72 : vector<4x1xf32> to vector<4x256xf32>
    %75 = vector.broadcast %73 : vector<1x256xf32> to vector<4x256xf32>
    %76 = arith.mulf %74, %75 : vector<4x256xf32>
    %77 = vector.extract_strided_slice %37 {offsets = [0, 5], sizes = [4, 1], strides = [1, 1]} : vector<4x36xf32> to vector<4x1xf32>
    %78 = vector.extract_strided_slice %71 {offsets = [1, 0], sizes = [1, 256], strides = [1, 1]} : vector<4x256xf32> to vector<1x256xf32>
    %79 = vector.broadcast %77 : vector<4x1xf32> to vector<4x256xf32>
    %80 = vector.broadcast %78 : vector<1x256xf32> to vector<4x256xf32>
    %81 = arith.mulf %79, %80 : vector<4x256xf32>
    %82 = vector.extract_strided_slice %37 {offsets = [0, 6], sizes = [4, 1], strides = [1, 1]} : vector<4x36xf32> to vector<4x1xf32>
    %83 = vector.extract_strided_slice %71 {offsets = [2, 0], sizes = [1, 256], strides = [1, 1]} : vector<4x256xf32> to vector<1x256xf32>
    %84 = vector.broadcast %82 : vector<4x1xf32> to vector<4x256xf32>
    %85 = vector.broadcast %83 : vector<1x256xf32> to vector<4x256xf32>
    %86 = arith.mulf %84, %85 : vector<4x256xf32>
    %87 = vector.extract_strided_slice %37 {offsets = [0, 7], sizes = [4, 1], strides = [1, 1]} : vector<4x36xf32> to vector<4x1xf32>
    %88 = vector.extract_strided_slice %71 {offsets = [3, 0], sizes = [1, 256], strides = [1, 1]} : vector<4x256xf32> to vector<1x256xf32>
    %89 = vector.broadcast %87 : vector<4x1xf32> to vector<4x256xf32>
    %90 = vector.broadcast %88 : vector<1x256xf32> to vector<4x256xf32>
    %91 = arith.mulf %89, %90 : vector<4x256xf32>
    %92 = arith.addf %76, %81 : vector<4x256xf32>
    %93 = arith.addf %86, %91 : vector<4x256xf32>
    %94 = arith.addf %92, %93 : vector<4x256xf32>
    %95 = vector.extract_strided_slice %42 {offsets = [0, 2], sizes = [4, 256], strides = [1, 1]} : vector<4x290xf32> to vector<4x256xf32>
    %cst_21 = arith.constant 0.000000e+00 : f32
    %96 = vector.shape_cast %36 : vector<1x256xi1> to vector<1x256xi1>
    %97 = vector.broadcast %96 : vector<1x256xi1> to vector<4x256xi1>
    %98 = vector.broadcast %cst_21 : f32 to vector<4x256xf32>
    %99 = arith.select %97, %95, %98 : vector<4x256xi1>, vector<4x256xf32>
    %100 = vector.extract_strided_slice %37 {offsets = [0, 8], sizes = [4, 1], strides = [1, 1]} : vector<4x36xf32> to vector<4x1xf32>
    %101 = vector.extract_strided_slice %99 {offsets = [0, 0], sizes = [1, 256], strides = [1, 1]} : vector<4x256xf32> to vector<1x256xf32>
    %102 = vector.broadcast %100 : vector<4x1xf32> to vector<4x256xf32>
    %103 = vector.broadcast %101 : vector<1x256xf32> to vector<4x256xf32>
    %104 = arith.mulf %102, %103 : vector<4x256xf32>
    %105 = vector.extract_strided_slice %37 {offsets = [0, 9], sizes = [4, 1], strides = [1, 1]} : vector<4x36xf32> to vector<4x1xf32>
    %106 = vector.extract_strided_slice %99 {offsets = [1, 0], sizes = [1, 256], strides = [1, 1]} : vector<4x256xf32> to vector<1x256xf32>
    %107 = vector.broadcast %105 : vector<4x1xf32> to vector<4x256xf32>
    %108 = vector.broadcast %106 : vector<1x256xf32> to vector<4x256xf32>
    %109 = arith.mulf %107, %108 : vector<4x256xf32>
    %110 = vector.extract_strided_slice %37 {offsets = [0, 10], sizes = [4, 1], strides = [1, 1]} : vector<4x36xf32> to vector<4x1xf32>
    %111 = vector.extract_strided_slice %99 {offsets = [2, 0], sizes = [1, 256], strides = [1, 1]} : vector<4x256xf32> to vector<1x256xf32>
    %112 = vector.broadcast %110 : vector<4x1xf32> to vector<4x256xf32>
    %113 = vector.broadcast %111 : vector<1x256xf32> to vector<4x256xf32>
    %114 = arith.mulf %112, %113 : vector<4x256xf32>
    %115 = vector.extract_strided_slice %37 {offsets = [0, 11], sizes = [4, 1], strides = [1, 1]} : vector<4x36xf32> to vector<4x1xf32>
    %116 = vector.extract_strided_slice %99 {offsets = [3, 0], sizes = [1, 256], strides = [1, 1]} : vector<4x256xf32> to vector<1x256xf32>
    %117 = vector.broadcast %115 : vector<4x1xf32> to vector<4x256xf32>
    %118 = vector.broadcast %116 : vector<1x256xf32> to vector<4x256xf32>
    %119 = arith.mulf %117, %118 : vector<4x256xf32>
    %120 = arith.addf %104, %109 : vector<4x256xf32>
    %121 = arith.addf %114, %119 : vector<4x256xf32>
    %122 = arith.addf %120, %121 : vector<4x256xf32>
    %123 = vector.extract_strided_slice %42 {offsets = [0, 16], sizes = [4, 256], strides = [1, 1]} : vector<4x290xf32> to vector<4x256xf32>
    %cst_22 = arith.constant 0.000000e+00 : f32
    %124 = vector.shape_cast %27 : vector<1x256xi1> to vector<1x256xi1>
    %125 = vector.broadcast %124 : vector<1x256xi1> to vector<4x256xi1>
    %126 = vector.broadcast %cst_22 : f32 to vector<4x256xf32>
    %127 = arith.select %125, %123, %126 : vector<4x256xi1>, vector<4x256xf32>
    %128 = vector.extract_strided_slice %37 {offsets = [0, 12], sizes = [4, 1], strides = [1, 1]} : vector<4x36xf32> to vector<4x1xf32>
    %129 = vector.extract_strided_slice %127 {offsets = [0, 0], sizes = [1, 256], strides = [1, 1]} : vector<4x256xf32> to vector<1x256xf32>
    %130 = vector.broadcast %128 : vector<4x1xf32> to vector<4x256xf32>
    %131 = vector.broadcast %129 : vector<1x256xf32> to vector<4x256xf32>
    %132 = arith.mulf %130, %131 : vector<4x256xf32>
    %133 = vector.extract_strided_slice %37 {offsets = [0, 13], sizes = [4, 1], strides = [1, 1]} : vector<4x36xf32> to vector<4x1xf32>
    %134 = vector.extract_strided_slice %127 {offsets = [1, 0], sizes = [1, 256], strides = [1, 1]} : vector<4x256xf32> to vector<1x256xf32>
    %135 = vector.broadcast %133 : vector<4x1xf32> to vector<4x256xf32>
    %136 = vector.broadcast %134 : vector<1x256xf32> to vector<4x256xf32>
    %137 = arith.mulf %135, %136 : vector<4x256xf32>
    %138 = vector.extract_strided_slice %37 {offsets = [0, 14], sizes = [4, 1], strides = [1, 1]} : vector<4x36xf32> to vector<4x1xf32>
    %139 = vector.extract_strided_slice %127 {offsets = [2, 0], sizes = [1, 256], strides = [1, 1]} : vector<4x256xf32> to vector<1x256xf32>
    %140 = vector.broadcast %138 : vector<4x1xf32> to vector<4x256xf32>
    %141 = vector.broadcast %139 : vector<1x256xf32> to vector<4x256xf32>
    %142 = arith.mulf %140, %141 : vector<4x256xf32>
    %143 = vector.extract_strided_slice %37 {offsets = [0, 15], sizes = [4, 1], strides = [1, 1]} : vector<4x36xf32> to vector<4x1xf32>
    %144 = vector.extract_strided_slice %127 {offsets = [3, 0], sizes = [1, 256], strides = [1, 1]} : vector<4x256xf32> to vector<1x256xf32>
    %145 = vector.broadcast %143 : vector<4x1xf32> to vector<4x256xf32>
    %146 = vector.broadcast %144 : vector<1x256xf32> to vector<4x256xf32>
    %147 = arith.mulf %145, %146 : vector<4x256xf32>
    %148 = arith.addf %132, %137 : vector<4x256xf32>
    %149 = arith.addf %142, %147 : vector<4x256xf32>
    %150 = arith.addf %148, %149 : vector<4x256xf32>
    %151 = vector.extract_strided_slice %42 {offsets = [0, 17], sizes = [4, 256], strides = [1, 1]} : vector<4x290xf32> to vector<4x256xf32>
    %152 = vector.extract_strided_slice %37 {offsets = [0, 16], sizes = [4, 1], strides = [1, 1]} : vector<4x36xf32> to vector<4x1xf32>
    %153 = vector.extract_strided_slice %151 {offsets = [0, 0], sizes = [1, 256], strides = [1, 1]} : vector<4x256xf32> to vector<1x256xf32>
    %154 = vector.broadcast %152 : vector<4x1xf32> to vector<4x256xf32>
    %155 = vector.broadcast %153 : vector<1x256xf32> to vector<4x256xf32>
    %156 = arith.mulf %154, %155 : vector<4x256xf32>
    %157 = vector.extract_strided_slice %37 {offsets = [0, 17], sizes = [4, 1], strides = [1, 1]} : vector<4x36xf32> to vector<4x1xf32>
    %158 = vector.extract_strided_slice %151 {offsets = [1, 0], sizes = [1, 256], strides = [1, 1]} : vector<4x256xf32> to vector<1x256xf32>
    %159 = vector.broadcast %157 : vector<4x1xf32> to vector<4x256xf32>
    %160 = vector.broadcast %158 : vector<1x256xf32> to vector<4x256xf32>
    %161 = arith.mulf %159, %160 : vector<4x256xf32>
    %162 = vector.extract_strided_slice %37 {offsets = [0, 18], sizes = [4, 1], strides = [1, 1]} : vector<4x36xf32> to vector<4x1xf32>
    %163 = vector.extract_strided_slice %151 {offsets = [2, 0], sizes = [1, 256], strides = [1, 1]} : vector<4x256xf32> to vector<1x256xf32>
    %164 = vector.broadcast %162 : vector<4x1xf32> to vector<4x256xf32>
    %165 = vector.broadcast %163 : vector<1x256xf32> to vector<4x256xf32>
    %166 = arith.mulf %164, %165 : vector<4x256xf32>
    %167 = vector.extract_strided_slice %37 {offsets = [0, 19], sizes = [4, 1], strides = [1, 1]} : vector<4x36xf32> to vector<4x1xf32>
    %168 = vector.extract_strided_slice %151 {offsets = [3, 0], sizes = [1, 256], strides = [1, 1]} : vector<4x256xf32> to vector<1x256xf32>
    %169 = vector.broadcast %167 : vector<4x1xf32> to vector<4x256xf32>
    %170 = vector.broadcast %168 : vector<1x256xf32> to vector<4x256xf32>
    %171 = arith.mulf %169, %170 : vector<4x256xf32>
    %172 = arith.addf %156, %161 : vector<4x256xf32>
    %173 = arith.addf %166, %171 : vector<4x256xf32>
    %174 = arith.addf %172, %173 : vector<4x256xf32>
    %175 = vector.extract_strided_slice %42 {offsets = [0, 18], sizes = [4, 256], strides = [1, 1]} : vector<4x290xf32> to vector<4x256xf32>
    %cst_23 = arith.constant 0.000000e+00 : f32
    %176 = vector.shape_cast %36 : vector<1x256xi1> to vector<1x256xi1>
    %177 = vector.broadcast %176 : vector<1x256xi1> to vector<4x256xi1>
    %178 = vector.broadcast %cst_23 : f32 to vector<4x256xf32>
    %179 = arith.select %177, %175, %178 : vector<4x256xi1>, vector<4x256xf32>
    %180 = vector.extract_strided_slice %37 {offsets = [0, 20], sizes = [4, 1], strides = [1, 1]} : vector<4x36xf32> to vector<4x1xf32>
    %181 = vector.extract_strided_slice %179 {offsets = [0, 0], sizes = [1, 256], strides = [1, 1]} : vector<4x256xf32> to vector<1x256xf32>
    %182 = vector.broadcast %180 : vector<4x1xf32> to vector<4x256xf32>
    %183 = vector.broadcast %181 : vector<1x256xf32> to vector<4x256xf32>
    %184 = arith.mulf %182, %183 : vector<4x256xf32>
    %185 = vector.extract_strided_slice %37 {offsets = [0, 21], sizes = [4, 1], strides = [1, 1]} : vector<4x36xf32> to vector<4x1xf32>
    %186 = vector.extract_strided_slice %179 {offsets = [1, 0], sizes = [1, 256], strides = [1, 1]} : vector<4x256xf32> to vector<1x256xf32>
    %187 = vector.broadcast %185 : vector<4x1xf32> to vector<4x256xf32>
    %188 = vector.broadcast %186 : vector<1x256xf32> to vector<4x256xf32>
    %189 = arith.mulf %187, %188 : vector<4x256xf32>
    %190 = vector.extract_strided_slice %37 {offsets = [0, 22], sizes = [4, 1], strides = [1, 1]} : vector<4x36xf32> to vector<4x1xf32>
    %191 = vector.extract_strided_slice %179 {offsets = [2, 0], sizes = [1, 256], strides = [1, 1]} : vector<4x256xf32> to vector<1x256xf32>
    %192 = vector.broadcast %190 : vector<4x1xf32> to vector<4x256xf32>
    %193 = vector.broadcast %191 : vector<1x256xf32> to vector<4x256xf32>
    %194 = arith.mulf %192, %193 : vector<4x256xf32>
    %195 = vector.extract_strided_slice %37 {offsets = [0, 23], sizes = [4, 1], strides = [1, 1]} : vector<4x36xf32> to vector<4x1xf32>
    %196 = vector.extract_strided_slice %179 {offsets = [3, 0], sizes = [1, 256], strides = [1, 1]} : vector<4x256xf32> to vector<1x256xf32>
    %197 = vector.broadcast %195 : vector<4x1xf32> to vector<4x256xf32>
    %198 = vector.broadcast %196 : vector<1x256xf32> to vector<4x256xf32>
    %199 = arith.mulf %197, %198 : vector<4x256xf32>
    %200 = arith.addf %184, %189 : vector<4x256xf32>
    %201 = arith.addf %194, %199 : vector<4x256xf32>
    %202 = arith.addf %200, %201 : vector<4x256xf32>
    %203 = vector.extract_strided_slice %42 {offsets = [0, 32], sizes = [4, 256], strides = [1, 1]} : vector<4x290xf32> to vector<4x256xf32>
    %cst_24 = arith.constant 0.000000e+00 : f32
    %204 = vector.shape_cast %27 : vector<1x256xi1> to vector<1x256xi1>
    %205 = vector.broadcast %204 : vector<1x256xi1> to vector<4x256xi1>
    %206 = vector.broadcast %cst_24 : f32 to vector<4x256xf32>
    %207 = arith.select %205, %203, %206 : vector<4x256xi1>, vector<4x256xf32>
    %208 = vector.extract_strided_slice %37 {offsets = [0, 24], sizes = [4, 1], strides = [1, 1]} : vector<4x36xf32> to vector<4x1xf32>
    %209 = vector.extract_strided_slice %207 {offsets = [0, 0], sizes = [1, 256], strides = [1, 1]} : vector<4x256xf32> to vector<1x256xf32>
    %210 = vector.broadcast %208 : vector<4x1xf32> to vector<4x256xf32>
    %211 = vector.broadcast %209 : vector<1x256xf32> to vector<4x256xf32>
    %212 = arith.mulf %210, %211 : vector<4x256xf32>
    %213 = vector.extract_strided_slice %37 {offsets = [0, 25], sizes = [4, 1], strides = [1, 1]} : vector<4x36xf32> to vector<4x1xf32>
    %214 = vector.extract_strided_slice %207 {offsets = [1, 0], sizes = [1, 256], strides = [1, 1]} : vector<4x256xf32> to vector<1x256xf32>
    %215 = vector.broadcast %213 : vector<4x1xf32> to vector<4x256xf32>
    %216 = vector.broadcast %214 : vector<1x256xf32> to vector<4x256xf32>
    %217 = arith.mulf %215, %216 : vector<4x256xf32>
    %218 = vector.extract_strided_slice %37 {offsets = [0, 26], sizes = [4, 1], strides = [1, 1]} : vector<4x36xf32> to vector<4x1xf32>
    %219 = vector.extract_strided_slice %207 {offsets = [2, 0], sizes = [1, 256], strides = [1, 1]} : vector<4x256xf32> to vector<1x256xf32>
    %220 = vector.broadcast %218 : vector<4x1xf32> to vector<4x256xf32>
    %221 = vector.broadcast %219 : vector<1x256xf32> to vector<4x256xf32>
    %222 = arith.mulf %220, %221 : vector<4x256xf32>
    %223 = vector.extract_strided_slice %37 {offsets = [0, 27], sizes = [4, 1], strides = [1, 1]} : vector<4x36xf32> to vector<4x1xf32>
    %224 = vector.extract_strided_slice %207 {offsets = [3, 0], sizes = [1, 256], strides = [1, 1]} : vector<4x256xf32> to vector<1x256xf32>
    %225 = vector.broadcast %223 : vector<4x1xf32> to vector<4x256xf32>
    %226 = vector.broadcast %224 : vector<1x256xf32> to vector<4x256xf32>
    %227 = arith.mulf %225, %226 : vector<4x256xf32>
    %228 = arith.addf %212, %217 : vector<4x256xf32>
    %229 = arith.addf %222, %227 : vector<4x256xf32>
    %230 = arith.addf %228, %229 : vector<4x256xf32>
    %231 = vector.extract_strided_slice %42 {offsets = [0, 33], sizes = [4, 256], strides = [1, 1]} : vector<4x290xf32> to vector<4x256xf32>
    %232 = vector.extract_strided_slice %37 {offsets = [0, 28], sizes = [4, 1], strides = [1, 1]} : vector<4x36xf32> to vector<4x1xf32>
    %233 = vector.extract_strided_slice %231 {offsets = [0, 0], sizes = [1, 256], strides = [1, 1]} : vector<4x256xf32> to vector<1x256xf32>
    %234 = vector.broadcast %232 : vector<4x1xf32> to vector<4x256xf32>
    %235 = vector.broadcast %233 : vector<1x256xf32> to vector<4x256xf32>
    %236 = arith.mulf %234, %235 : vector<4x256xf32>
    %237 = vector.extract_strided_slice %37 {offsets = [0, 29], sizes = [4, 1], strides = [1, 1]} : vector<4x36xf32> to vector<4x1xf32>
    %238 = vector.extract_strided_slice %231 {offsets = [1, 0], sizes = [1, 256], strides = [1, 1]} : vector<4x256xf32> to vector<1x256xf32>
    %239 = vector.broadcast %237 : vector<4x1xf32> to vector<4x256xf32>
    %240 = vector.broadcast %238 : vector<1x256xf32> to vector<4x256xf32>
    %241 = arith.mulf %239, %240 : vector<4x256xf32>
    %242 = vector.extract_strided_slice %37 {offsets = [0, 30], sizes = [4, 1], strides = [1, 1]} : vector<4x36xf32> to vector<4x1xf32>
    %243 = vector.extract_strided_slice %231 {offsets = [2, 0], sizes = [1, 256], strides = [1, 1]} : vector<4x256xf32> to vector<1x256xf32>
    %244 = vector.broadcast %242 : vector<4x1xf32> to vector<4x256xf32>
    %245 = vector.broadcast %243 : vector<1x256xf32> to vector<4x256xf32>
    %246 = arith.mulf %244, %245 : vector<4x256xf32>
    %247 = vector.extract_strided_slice %37 {offsets = [0, 31], sizes = [4, 1], strides = [1, 1]} : vector<4x36xf32> to vector<4x1xf32>
    %248 = vector.extract_strided_slice %231 {offsets = [3, 0], sizes = [1, 256], strides = [1, 1]} : vector<4x256xf32> to vector<1x256xf32>
    %249 = vector.broadcast %247 : vector<4x1xf32> to vector<4x256xf32>
    %250 = vector.broadcast %248 : vector<1x256xf32> to vector<4x256xf32>
    %251 = arith.mulf %249, %250 : vector<4x256xf32>
    %252 = arith.addf %236, %241 : vector<4x256xf32>
    %253 = arith.addf %246, %251 : vector<4x256xf32>
    %254 = arith.addf %252, %253 : vector<4x256xf32>
    %255 = vector.extract_strided_slice %42 {offsets = [0, 34], sizes = [4, 256], strides = [1, 1]} : vector<4x290xf32> to vector<4x256xf32>
    %cst_25 = arith.constant 0.000000e+00 : f32
    %256 = vector.shape_cast %36 : vector<1x256xi1> to vector<1x256xi1>
    %257 = vector.broadcast %256 : vector<1x256xi1> to vector<4x256xi1>
    %258 = vector.broadcast %cst_25 : f32 to vector<4x256xf32>
    %259 = arith.select %257, %255, %258 : vector<4x256xi1>, vector<4x256xf32>
    %260 = vector.extract_strided_slice %37 {offsets = [0, 32], sizes = [4, 1], strides = [1, 1]} : vector<4x36xf32> to vector<4x1xf32>
    %261 = vector.extract_strided_slice %259 {offsets = [0, 0], sizes = [1, 256], strides = [1, 1]} : vector<4x256xf32> to vector<1x256xf32>
    %262 = vector.broadcast %260 : vector<4x1xf32> to vector<4x256xf32>
    %263 = vector.broadcast %261 : vector<1x256xf32> to vector<4x256xf32>
    %264 = arith.mulf %262, %263 : vector<4x256xf32>
    %265 = vector.extract_strided_slice %37 {offsets = [0, 33], sizes = [4, 1], strides = [1, 1]} : vector<4x36xf32> to vector<4x1xf32>
    %266 = vector.extract_strided_slice %259 {offsets = [1, 0], sizes = [1, 256], strides = [1, 1]} : vector<4x256xf32> to vector<1x256xf32>
    %267 = vector.broadcast %265 : vector<4x1xf32> to vector<4x256xf32>
    %268 = vector.broadcast %266 : vector<1x256xf32> to vector<4x256xf32>
    %269 = arith.mulf %267, %268 : vector<4x256xf32>
    %270 = vector.extract_strided_slice %37 {offsets = [0, 34], sizes = [4, 1], strides = [1, 1]} : vector<4x36xf32> to vector<4x1xf32>
    %271 = vector.extract_strided_slice %259 {offsets = [2, 0], sizes = [1, 256], strides = [1, 1]} : vector<4x256xf32> to vector<1x256xf32>
    %272 = vector.broadcast %270 : vector<4x1xf32> to vector<4x256xf32>
    %273 = vector.broadcast %271 : vector<1x256xf32> to vector<4x256xf32>
    %274 = arith.mulf %272, %273 : vector<4x256xf32>
    %275 = vector.extract_strided_slice %37 {offsets = [0, 35], sizes = [4, 1], strides = [1, 1]} : vector<4x36xf32> to vector<4x1xf32>
    %276 = vector.extract_strided_slice %259 {offsets = [3, 0], sizes = [1, 256], strides = [1, 1]} : vector<4x256xf32> to vector<1x256xf32>
    %277 = vector.broadcast %275 : vector<4x1xf32> to vector<4x256xf32>
    %278 = vector.broadcast %276 : vector<1x256xf32> to vector<4x256xf32>
    %279 = arith.mulf %277, %278 : vector<4x256xf32>
    %280 = arith.addf %264, %269 : vector<4x256xf32>
    %281 = arith.addf %274, %279 : vector<4x256xf32>
    %282 = arith.addf %280, %281 : vector<4x256xf32>
    %283 = arith.addf %70, %94 : vector<4x256xf32>
    %284 = arith.addf %122, %150 : vector<4x256xf32>
    %285 = arith.addf %174, %202 : vector<4x256xf32>
    %286 = arith.addf %230, %254 : vector<4x256xf32>
    %287 = arith.addf %283, %284 : vector<4x256xf32>
    %288 = arith.addf %285, %286 : vector<4x256xf32>
    %289 = arith.addf %287, %288 : vector<4x256xf32>
    %290 = arith.addf %289, %282 : vector<4x256xf32>
    %291 = vector.broadcast %39 : vector<4x1xf32> to vector<4x256xf32>
    %292 = arith.addf %290, %291 : vector<4x256xf32>
    %cst_26 = arith.constant 0.000000e+00 : f32
    %293 = vector.broadcast %cst_26 : f32 to vector<4x256xf32>
    %294 = arith.maximumf %292, %293 : vector<4x256xf32>
    %295 = tpu.concatenate %41, %294, %41 in 1 : vector<4x17xf32>, vector<4x256xf32>, vector<4x17xf32> -> vector<4x290xf32>
    %296 = vector.extract_strided_slice %295 {offsets = [0, 0], sizes = [4, 256], strides = [1, 1]} : vector<4x290xf32> to vector<4x256xf32>
    %cst_27 = arith.constant 0.000000e+00 : f32
    %297 = vector.shape_cast %27 : vector<1x256xi1> to vector<1x256xi1>
    %298 = vector.broadcast %297 : vector<1x256xi1> to vector<4x256xi1>
    %299 = vector.broadcast %cst_27 : f32 to vector<4x256xf32>
    %300 = arith.select %298, %296, %299 : vector<4x256xi1>, vector<4x256xf32>
    %301 = vector.extract_strided_slice %38 {offsets = [0, 0], sizes = [4, 1], strides = [1, 1]} : vector<4x36xf32> to vector<4x1xf32>
    %302 = vector.extract_strided_slice %300 {offsets = [0, 0], sizes = [1, 256], strides = [1, 1]} : vector<4x256xf32> to vector<1x256xf32>
    %303 = vector.broadcast %301 : vector<4x1xf32> to vector<4x256xf32>
    %304 = vector.broadcast %302 : vector<1x256xf32> to vector<4x256xf32>
    %305 = arith.mulf %303, %304 : vector<4x256xf32>
    %306 = vector.extract_strided_slice %38 {offsets = [0, 1], sizes = [4, 1], strides = [1, 1]} : vector<4x36xf32> to vector<4x1xf32>
    %307 = vector.extract_strided_slice %300 {offsets = [1, 0], sizes = [1, 256], strides = [1, 1]} : vector<4x256xf32> to vector<1x256xf32>
    %308 = vector.broadcast %306 : vector<4x1xf32> to vector<4x256xf32>
    %309 = vector.broadcast %307 : vector<1x256xf32> to vector<4x256xf32>
    %310 = arith.mulf %308, %309 : vector<4x256xf32>
    %311 = vector.extract_strided_slice %38 {offsets = [0, 2], sizes = [4, 1], strides = [1, 1]} : vector<4x36xf32> to vector<4x1xf32>
    %312 = vector.extract_strided_slice %300 {offsets = [2, 0], sizes = [1, 256], strides = [1, 1]} : vector<4x256xf32> to vector<1x256xf32>
    %313 = vector.broadcast %311 : vector<4x1xf32> to vector<4x256xf32>
    %314 = vector.broadcast %312 : vector<1x256xf32> to vector<4x256xf32>
    %315 = arith.mulf %313, %314 : vector<4x256xf32>
    %316 = vector.extract_strided_slice %38 {offsets = [0, 3], sizes = [4, 1], strides = [1, 1]} : vector<4x36xf32> to vector<4x1xf32>
    %317 = vector.extract_strided_slice %300 {offsets = [3, 0], sizes = [1, 256], strides = [1, 1]} : vector<4x256xf32> to vector<1x256xf32>
    %318 = vector.broadcast %316 : vector<4x1xf32> to vector<4x256xf32>
    %319 = vector.broadcast %317 : vector<1x256xf32> to vector<4x256xf32>
    %320 = arith.mulf %318, %319 : vector<4x256xf32>
    %321 = arith.addf %305, %310 : vector<4x256xf32>
    %322 = arith.addf %315, %320 : vector<4x256xf32>
    %323 = arith.addf %321, %322 : vector<4x256xf32>
    %324 = vector.extract_strided_slice %295 {offsets = [0, 1], sizes = [4, 256], strides = [1, 1]} : vector<4x290xf32> to vector<4x256xf32>
    %325 = vector.extract_strided_slice %38 {offsets = [0, 4], sizes = [4, 1], strides = [1, 1]} : vector<4x36xf32> to vector<4x1xf32>
    %326 = vector.extract_strided_slice %324 {offsets = [0, 0], sizes = [1, 256], strides = [1, 1]} : vector<4x256xf32> to vector<1x256xf32>
    %327 = vector.broadcast %325 : vector<4x1xf32> to vector<4x256xf32>
    %328 = vector.broadcast %326 : vector<1x256xf32> to vector<4x256xf32>
    %329 = arith.mulf %327, %328 : vector<4x256xf32>
    %330 = vector.extract_strided_slice %38 {offsets = [0, 5], sizes = [4, 1], strides = [1, 1]} : vector<4x36xf32> to vector<4x1xf32>
    %331 = vector.extract_strided_slice %324 {offsets = [1, 0], sizes = [1, 256], strides = [1, 1]} : vector<4x256xf32> to vector<1x256xf32>
    %332 = vector.broadcast %330 : vector<4x1xf32> to vector<4x256xf32>
    %333 = vector.broadcast %331 : vector<1x256xf32> to vector<4x256xf32>
    %334 = arith.mulf %332, %333 : vector<4x256xf32>
    %335 = vector.extract_strided_slice %38 {offsets = [0, 6], sizes = [4, 1], strides = [1, 1]} : vector<4x36xf32> to vector<4x1xf32>
    %336 = vector.extract_strided_slice %324 {offsets = [2, 0], sizes = [1, 256], strides = [1, 1]} : vector<4x256xf32> to vector<1x256xf32>
    %337 = vector.broadcast %335 : vector<4x1xf32> to vector<4x256xf32>
    %338 = vector.broadcast %336 : vector<1x256xf32> to vector<4x256xf32>
    %339 = arith.mulf %337, %338 : vector<4x256xf32>
    %340 = vector.extract_strided_slice %38 {offsets = [0, 7], sizes = [4, 1], strides = [1, 1]} : vector<4x36xf32> to vector<4x1xf32>
    %341 = vector.extract_strided_slice %324 {offsets = [3, 0], sizes = [1, 256], strides = [1, 1]} : vector<4x256xf32> to vector<1x256xf32>
    %342 = vector.broadcast %340 : vector<4x1xf32> to vector<4x256xf32>
    %343 = vector.broadcast %341 : vector<1x256xf32> to vector<4x256xf32>
    %344 = arith.mulf %342, %343 : vector<4x256xf32>
    %345 = arith.addf %329, %334 : vector<4x256xf32>
    %346 = arith.addf %339, %344 : vector<4x256xf32>
    %347 = arith.addf %345, %346 : vector<4x256xf32>
    %348 = vector.extract_strided_slice %295 {offsets = [0, 2], sizes = [4, 256], strides = [1, 1]} : vector<4x290xf32> to vector<4x256xf32>
    %cst_28 = arith.constant 0.000000e+00 : f32
    %349 = vector.shape_cast %36 : vector<1x256xi1> to vector<1x256xi1>
    %350 = vector.broadcast %349 : vector<1x256xi1> to vector<4x256xi1>
    %351 = vector.broadcast %cst_28 : f32 to vector<4x256xf32>
    %352 = arith.select %350, %348, %351 : vector<4x256xi1>, vector<4x256xf32>
    %353 = vector.extract_strided_slice %38 {offsets = [0, 8], sizes = [4, 1], strides = [1, 1]} : vector<4x36xf32> to vector<4x1xf32>
    %354 = vector.extract_strided_slice %352 {offsets = [0, 0], sizes = [1, 256], strides = [1, 1]} : vector<4x256xf32> to vector<1x256xf32>
    %355 = vector.broadcast %353 : vector<4x1xf32> to vector<4x256xf32>
    %356 = vector.broadcast %354 : vector<1x256xf32> to vector<4x256xf32>
    %357 = arith.mulf %355, %356 : vector<4x256xf32>
    %358 = vector.extract_strided_slice %38 {offsets = [0, 9], sizes = [4, 1], strides = [1, 1]} : vector<4x36xf32> to vector<4x1xf32>
    %359 = vector.extract_strided_slice %352 {offsets = [1, 0], sizes = [1, 256], strides = [1, 1]} : vector<4x256xf32> to vector<1x256xf32>
    %360 = vector.broadcast %358 : vector<4x1xf32> to vector<4x256xf32>
    %361 = vector.broadcast %359 : vector<1x256xf32> to vector<4x256xf32>
    %362 = arith.mulf %360, %361 : vector<4x256xf32>
    %363 = vector.extract_strided_slice %38 {offsets = [0, 10], sizes = [4, 1], strides = [1, 1]} : vector<4x36xf32> to vector<4x1xf32>
    %364 = vector.extract_strided_slice %352 {offsets = [2, 0], sizes = [1, 256], strides = [1, 1]} : vector<4x256xf32> to vector<1x256xf32>
    %365 = vector.broadcast %363 : vector<4x1xf32> to vector<4x256xf32>
    %366 = vector.broadcast %364 : vector<1x256xf32> to vector<4x256xf32>
    %367 = arith.mulf %365, %366 : vector<4x256xf32>
    %368 = vector.extract_strided_slice %38 {offsets = [0, 11], sizes = [4, 1], strides = [1, 1]} : vector<4x36xf32> to vector<4x1xf32>
    %369 = vector.extract_strided_slice %352 {offsets = [3, 0], sizes = [1, 256], strides = [1, 1]} : vector<4x256xf32> to vector<1x256xf32>
    %370 = vector.broadcast %368 : vector<4x1xf32> to vector<4x256xf32>
    %371 = vector.broadcast %369 : vector<1x256xf32> to vector<4x256xf32>
    %372 = arith.mulf %370, %371 : vector<4x256xf32>
    %373 = arith.addf %357, %362 : vector<4x256xf32>
    %374 = arith.addf %367, %372 : vector<4x256xf32>
    %375 = arith.addf %373, %374 : vector<4x256xf32>
    %376 = vector.extract_strided_slice %295 {offsets = [0, 16], sizes = [4, 256], strides = [1, 1]} : vector<4x290xf32> to vector<4x256xf32>
    %cst_29 = arith.constant 0.000000e+00 : f32
    %377 = vector.shape_cast %27 : vector<1x256xi1> to vector<1x256xi1>
    %378 = vector.broadcast %377 : vector<1x256xi1> to vector<4x256xi1>
    %379 = vector.broadcast %cst_29 : f32 to vector<4x256xf32>
    %380 = arith.select %378, %376, %379 : vector<4x256xi1>, vector<4x256xf32>
    %381 = vector.extract_strided_slice %38 {offsets = [0, 12], sizes = [4, 1], strides = [1, 1]} : vector<4x36xf32> to vector<4x1xf32>
    %382 = vector.extract_strided_slice %380 {offsets = [0, 0], sizes = [1, 256], strides = [1, 1]} : vector<4x256xf32> to vector<1x256xf32>
    %383 = vector.broadcast %381 : vector<4x1xf32> to vector<4x256xf32>
    %384 = vector.broadcast %382 : vector<1x256xf32> to vector<4x256xf32>
    %385 = arith.mulf %383, %384 : vector<4x256xf32>
    %386 = vector.extract_strided_slice %38 {offsets = [0, 13], sizes = [4, 1], strides = [1, 1]} : vector<4x36xf32> to vector<4x1xf32>
    %387 = vector.extract_strided_slice %380 {offsets = [1, 0], sizes = [1, 256], strides = [1, 1]} : vector<4x256xf32> to vector<1x256xf32>
    %388 = vector.broadcast %386 : vector<4x1xf32> to vector<4x256xf32>
    %389 = vector.broadcast %387 : vector<1x256xf32> to vector<4x256xf32>
    %390 = arith.mulf %388, %389 : vector<4x256xf32>
    %391 = vector.extract_strided_slice %38 {offsets = [0, 14], sizes = [4, 1], strides = [1, 1]} : vector<4x36xf32> to vector<4x1xf32>
    %392 = vector.extract_strided_slice %380 {offsets = [2, 0], sizes = [1, 256], strides = [1, 1]} : vector<4x256xf32> to vector<1x256xf32>
    %393 = vector.broadcast %391 : vector<4x1xf32> to vector<4x256xf32>
    %394 = vector.broadcast %392 : vector<1x256xf32> to vector<4x256xf32>
    %395 = arith.mulf %393, %394 : vector<4x256xf32>
    %396 = vector.extract_strided_slice %38 {offsets = [0, 15], sizes = [4, 1], strides = [1, 1]} : vector<4x36xf32> to vector<4x1xf32>
    %397 = vector.extract_strided_slice %380 {offsets = [3, 0], sizes = [1, 256], strides = [1, 1]} : vector<4x256xf32> to vector<1x256xf32>
    %398 = vector.broadcast %396 : vector<4x1xf32> to vector<4x256xf32>
    %399 = vector.broadcast %397 : vector<1x256xf32> to vector<4x256xf32>
    %400 = arith.mulf %398, %399 : vector<4x256xf32>
    %401 = arith.addf %385, %390 : vector<4x256xf32>
    %402 = arith.addf %395, %400 : vector<4x256xf32>
    %403 = arith.addf %401, %402 : vector<4x256xf32>
    %404 = vector.extract_strided_slice %295 {offsets = [0, 17], sizes = [4, 256], strides = [1, 1]} : vector<4x290xf32> to vector<4x256xf32>
    %405 = vector.extract_strided_slice %38 {offsets = [0, 16], sizes = [4, 1], strides = [1, 1]} : vector<4x36xf32> to vector<4x1xf32>
    %406 = vector.extract_strided_slice %404 {offsets = [0, 0], sizes = [1, 256], strides = [1, 1]} : vector<4x256xf32> to vector<1x256xf32>
    %407 = vector.broadcast %405 : vector<4x1xf32> to vector<4x256xf32>
    %408 = vector.broadcast %406 : vector<1x256xf32> to vector<4x256xf32>
    %409 = arith.mulf %407, %408 : vector<4x256xf32>
    %410 = vector.extract_strided_slice %38 {offsets = [0, 17], sizes = [4, 1], strides = [1, 1]} : vector<4x36xf32> to vector<4x1xf32>
    %411 = vector.extract_strided_slice %404 {offsets = [1, 0], sizes = [1, 256], strides = [1, 1]} : vector<4x256xf32> to vector<1x256xf32>
    %412 = vector.broadcast %410 : vector<4x1xf32> to vector<4x256xf32>
    %413 = vector.broadcast %411 : vector<1x256xf32> to vector<4x256xf32>
    %414 = arith.mulf %412, %413 : vector<4x256xf32>
    %415 = vector.extract_strided_slice %38 {offsets = [0, 18], sizes = [4, 1], strides = [1, 1]} : vector<4x36xf32> to vector<4x1xf32>
    %416 = vector.extract_strided_slice %404 {offsets = [2, 0], sizes = [1, 256], strides = [1, 1]} : vector<4x256xf32> to vector<1x256xf32>
    %417 = vector.broadcast %415 : vector<4x1xf32> to vector<4x256xf32>
    %418 = vector.broadcast %416 : vector<1x256xf32> to vector<4x256xf32>
    %419 = arith.mulf %417, %418 : vector<4x256xf32>
    %420 = vector.extract_strided_slice %38 {offsets = [0, 19], sizes = [4, 1], strides = [1, 1]} : vector<4x36xf32> to vector<4x1xf32>
    %421 = vector.extract_strided_slice %404 {offsets = [3, 0], sizes = [1, 256], strides = [1, 1]} : vector<4x256xf32> to vector<1x256xf32>
    %422 = vector.broadcast %420 : vector<4x1xf32> to vector<4x256xf32>
    %423 = vector.broadcast %421 : vector<1x256xf32> to vector<4x256xf32>
    %424 = arith.mulf %422, %423 : vector<4x256xf32>
    %425 = arith.addf %409, %414 : vector<4x256xf32>
    %426 = arith.addf %419, %424 : vector<4x256xf32>
    %427 = arith.addf %425, %426 : vector<4x256xf32>
    %428 = vector.extract_strided_slice %295 {offsets = [0, 18], sizes = [4, 256], strides = [1, 1]} : vector<4x290xf32> to vector<4x256xf32>
    %cst_30 = arith.constant 0.000000e+00 : f32
    %429 = vector.shape_cast %36 : vector<1x256xi1> to vector<1x256xi1>
    %430 = vector.broadcast %429 : vector<1x256xi1> to vector<4x256xi1>
    %431 = vector.broadcast %cst_30 : f32 to vector<4x256xf32>
    %432 = arith.select %430, %428, %431 : vector<4x256xi1>, vector<4x256xf32>
    %433 = vector.extract_strided_slice %38 {offsets = [0, 20], sizes = [4, 1], strides = [1, 1]} : vector<4x36xf32> to vector<4x1xf32>
    %434 = vector.extract_strided_slice %432 {offsets = [0, 0], sizes = [1, 256], strides = [1, 1]} : vector<4x256xf32> to vector<1x256xf32>
    %435 = vector.broadcast %433 : vector<4x1xf32> to vector<4x256xf32>
    %436 = vector.broadcast %434 : vector<1x256xf32> to vector<4x256xf32>
    %437 = arith.mulf %435, %436 : vector<4x256xf32>
    %438 = vector.extract_strided_slice %38 {offsets = [0, 21], sizes = [4, 1], strides = [1, 1]} : vector<4x36xf32> to vector<4x1xf32>
    %439 = vector.extract_strided_slice %432 {offsets = [1, 0], sizes = [1, 256], strides = [1, 1]} : vector<4x256xf32> to vector<1x256xf32>
    %440 = vector.broadcast %438 : vector<4x1xf32> to vector<4x256xf32>
    %441 = vector.broadcast %439 : vector<1x256xf32> to vector<4x256xf32>
    %442 = arith.mulf %440, %441 : vector<4x256xf32>
    %443 = vector.extract_strided_slice %38 {offsets = [0, 22], sizes = [4, 1], strides = [1, 1]} : vector<4x36xf32> to vector<4x1xf32>
    %444 = vector.extract_strided_slice %432 {offsets = [2, 0], sizes = [1, 256], strides = [1, 1]} : vector<4x256xf32> to vector<1x256xf32>
    %445 = vector.broadcast %443 : vector<4x1xf32> to vector<4x256xf32>
    %446 = vector.broadcast %444 : vector<1x256xf32> to vector<4x256xf32>
    %447 = arith.mulf %445, %446 : vector<4x256xf32>
    %448 = vector.extract_strided_slice %38 {offsets = [0, 23], sizes = [4, 1], strides = [1, 1]} : vector<4x36xf32> to vector<4x1xf32>
    %449 = vector.extract_strided_slice %432 {offsets = [3, 0], sizes = [1, 256], strides = [1, 1]} : vector<4x256xf32> to vector<1x256xf32>
    %450 = vector.broadcast %448 : vector<4x1xf32> to vector<4x256xf32>
    %451 = vector.broadcast %449 : vector<1x256xf32> to vector<4x256xf32>
    %452 = arith.mulf %450, %451 : vector<4x256xf32>
    %453 = arith.addf %437, %442 : vector<4x256xf32>
    %454 = arith.addf %447, %452 : vector<4x256xf32>
    %455 = arith.addf %453, %454 : vector<4x256xf32>
    %456 = vector.extract_strided_slice %295 {offsets = [0, 32], sizes = [4, 256], strides = [1, 1]} : vector<4x290xf32> to vector<4x256xf32>
    %cst_31 = arith.constant 0.000000e+00 : f32
    %457 = vector.shape_cast %27 : vector<1x256xi1> to vector<1x256xi1>
    %458 = vector.broadcast %457 : vector<1x256xi1> to vector<4x256xi1>
    %459 = vector.broadcast %cst_31 : f32 to vector<4x256xf32>
    %460 = arith.select %458, %456, %459 : vector<4x256xi1>, vector<4x256xf32>
    %461 = vector.extract_strided_slice %38 {offsets = [0, 24], sizes = [4, 1], strides = [1, 1]} : vector<4x36xf32> to vector<4x1xf32>
    %462 = vector.extract_strided_slice %460 {offsets = [0, 0], sizes = [1, 256], strides = [1, 1]} : vector<4x256xf32> to vector<1x256xf32>
    %463 = vector.broadcast %461 : vector<4x1xf32> to vector<4x256xf32>
    %464 = vector.broadcast %462 : vector<1x256xf32> to vector<4x256xf32>
    %465 = arith.mulf %463, %464 : vector<4x256xf32>
    %466 = vector.extract_strided_slice %38 {offsets = [0, 25], sizes = [4, 1], strides = [1, 1]} : vector<4x36xf32> to vector<4x1xf32>
    %467 = vector.extract_strided_slice %460 {offsets = [1, 0], sizes = [1, 256], strides = [1, 1]} : vector<4x256xf32> to vector<1x256xf32>
    %468 = vector.broadcast %466 : vector<4x1xf32> to vector<4x256xf32>
    %469 = vector.broadcast %467 : vector<1x256xf32> to vector<4x256xf32>
    %470 = arith.mulf %468, %469 : vector<4x256xf32>
    %471 = vector.extract_strided_slice %38 {offsets = [0, 26], sizes = [4, 1], strides = [1, 1]} : vector<4x36xf32> to vector<4x1xf32>
    %472 = vector.extract_strided_slice %460 {offsets = [2, 0], sizes = [1, 256], strides = [1, 1]} : vector<4x256xf32> to vector<1x256xf32>
    %473 = vector.broadcast %471 : vector<4x1xf32> to vector<4x256xf32>
    %474 = vector.broadcast %472 : vector<1x256xf32> to vector<4x256xf32>
    %475 = arith.mulf %473, %474 : vector<4x256xf32>
    %476 = vector.extract_strided_slice %38 {offsets = [0, 27], sizes = [4, 1], strides = [1, 1]} : vector<4x36xf32> to vector<4x1xf32>
    %477 = vector.extract_strided_slice %460 {offsets = [3, 0], sizes = [1, 256], strides = [1, 1]} : vector<4x256xf32> to vector<1x256xf32>
    %478 = vector.broadcast %476 : vector<4x1xf32> to vector<4x256xf32>
    %479 = vector.broadcast %477 : vector<1x256xf32> to vector<4x256xf32>
    %480 = arith.mulf %478, %479 : vector<4x256xf32>
    %481 = arith.addf %465, %470 : vector<4x256xf32>
    %482 = arith.addf %475, %480 : vector<4x256xf32>
    %483 = arith.addf %481, %482 : vector<4x256xf32>
    %484 = vector.extract_strided_slice %295 {offsets = [0, 33], sizes = [4, 256], strides = [1, 1]} : vector<4x290xf32> to vector<4x256xf32>
    %485 = vector.extract_strided_slice %38 {offsets = [0, 28], sizes = [4, 1], strides = [1, 1]} : vector<4x36xf32> to vector<4x1xf32>
    %486 = vector.extract_strided_slice %484 {offsets = [0, 0], sizes = [1, 256], strides = [1, 1]} : vector<4x256xf32> to vector<1x256xf32>
    %487 = vector.broadcast %485 : vector<4x1xf32> to vector<4x256xf32>
    %488 = vector.broadcast %486 : vector<1x256xf32> to vector<4x256xf32>
    %489 = arith.mulf %487, %488 : vector<4x256xf32>
    %490 = vector.extract_strided_slice %38 {offsets = [0, 29], sizes = [4, 1], strides = [1, 1]} : vector<4x36xf32> to vector<4x1xf32>
    %491 = vector.extract_strided_slice %484 {offsets = [1, 0], sizes = [1, 256], strides = [1, 1]} : vector<4x256xf32> to vector<1x256xf32>
    %492 = vector.broadcast %490 : vector<4x1xf32> to vector<4x256xf32>
    %493 = vector.broadcast %491 : vector<1x256xf32> to vector<4x256xf32>
    %494 = arith.mulf %492, %493 : vector<4x256xf32>
    %495 = vector.extract_strided_slice %38 {offsets = [0, 30], sizes = [4, 1], strides = [1, 1]} : vector<4x36xf32> to vector<4x1xf32>
    %496 = vector.extract_strided_slice %484 {offsets = [2, 0], sizes = [1, 256], strides = [1, 1]} : vector<4x256xf32> to vector<1x256xf32>
    %497 = vector.broadcast %495 : vector<4x1xf32> to vector<4x256xf32>
    %498 = vector.broadcast %496 : vector<1x256xf32> to vector<4x256xf32>
    %499 = arith.mulf %497, %498 : vector<4x256xf32>
    %500 = vector.extract_strided_slice %38 {offsets = [0, 31], sizes = [4, 1], strides = [1, 1]} : vector<4x36xf32> to vector<4x1xf32>
    %501 = vector.extract_strided_slice %484 {offsets = [3, 0], sizes = [1, 256], strides = [1, 1]} : vector<4x256xf32> to vector<1x256xf32>
    %502 = vector.broadcast %500 : vector<4x1xf32> to vector<4x256xf32>
    %503 = vector.broadcast %501 : vector<1x256xf32> to vector<4x256xf32>
    %504 = arith.mulf %502, %503 : vector<4x256xf32>
    %505 = arith.addf %489, %494 : vector<4x256xf32>
    %506 = arith.addf %499, %504 : vector<4x256xf32>
    %507 = arith.addf %505, %506 : vector<4x256xf32>
    %508 = vector.extract_strided_slice %295 {offsets = [0, 34], sizes = [4, 256], strides = [1, 1]} : vector<4x290xf32> to vector<4x256xf32>
    %cst_32 = arith.constant 0.000000e+00 : f32
    %509 = vector.shape_cast %36 : vector<1x256xi1> to vector<1x256xi1>
    %510 = vector.broadcast %509 : vector<1x256xi1> to vector<4x256xi1>
    %511 = vector.broadcast %cst_32 : f32 to vector<4x256xf32>
    %512 = arith.select %510, %508, %511 : vector<4x256xi1>, vector<4x256xf32>
    %513 = vector.extract_strided_slice %38 {offsets = [0, 32], sizes = [4, 1], strides = [1, 1]} : vector<4x36xf32> to vector<4x1xf32>
    %514 = vector.extract_strided_slice %512 {offsets = [0, 0], sizes = [1, 256], strides = [1, 1]} : vector<4x256xf32> to vector<1x256xf32>
    %515 = vector.broadcast %513 : vector<4x1xf32> to vector<4x256xf32>
    %516 = vector.broadcast %514 : vector<1x256xf32> to vector<4x256xf32>
    %517 = arith.mulf %515, %516 : vector<4x256xf32>
    %518 = vector.extract_strided_slice %38 {offsets = [0, 33], sizes = [4, 1], strides = [1, 1]} : vector<4x36xf32> to vector<4x1xf32>
    %519 = vector.extract_strided_slice %512 {offsets = [1, 0], sizes = [1, 256], strides = [1, 1]} : vector<4x256xf32> to vector<1x256xf32>
    %520 = vector.broadcast %518 : vector<4x1xf32> to vector<4x256xf32>
    %521 = vector.broadcast %519 : vector<1x256xf32> to vector<4x256xf32>
    %522 = arith.mulf %520, %521 : vector<4x256xf32>
    %523 = vector.extract_strided_slice %38 {offsets = [0, 34], sizes = [4, 1], strides = [1, 1]} : vector<4x36xf32> to vector<4x1xf32>
    %524 = vector.extract_strided_slice %512 {offsets = [2, 0], sizes = [1, 256], strides = [1, 1]} : vector<4x256xf32> to vector<1x256xf32>
    %525 = vector.broadcast %523 : vector<4x1xf32> to vector<4x256xf32>
    %526 = vector.broadcast %524 : vector<1x256xf32> to vector<4x256xf32>
    %527 = arith.mulf %525, %526 : vector<4x256xf32>
    %528 = vector.extract_strided_slice %38 {offsets = [0, 35], sizes = [4, 1], strides = [1, 1]} : vector<4x36xf32> to vector<4x1xf32>
    %529 = vector.extract_strided_slice %512 {offsets = [3, 0], sizes = [1, 256], strides = [1, 1]} : vector<4x256xf32> to vector<1x256xf32>
    %530 = vector.broadcast %528 : vector<4x1xf32> to vector<4x256xf32>
    %531 = vector.broadcast %529 : vector<1x256xf32> to vector<4x256xf32>
    %532 = arith.mulf %530, %531 : vector<4x256xf32>
    %533 = arith.addf %517, %522 : vector<4x256xf32>
    %534 = arith.addf %527, %532 : vector<4x256xf32>
    %535 = arith.addf %533, %534 : vector<4x256xf32>
    %536 = arith.addf %323, %347 : vector<4x256xf32>
    %537 = arith.addf %375, %403 : vector<4x256xf32>
    %538 = arith.addf %427, %455 : vector<4x256xf32>
    %539 = arith.addf %483, %507 : vector<4x256xf32>
    %540 = arith.addf %536, %537 : vector<4x256xf32>
    %541 = arith.addf %538, %539 : vector<4x256xf32>
    %542 = arith.addf %540, %541 : vector<4x256xf32>
    %543 = arith.addf %542, %535 : vector<4x256xf32>
    %544 = vector.broadcast %40 : vector<4x1xf32> to vector<4x256xf32>
    %545 = arith.addf %543, %544 : vector<4x256xf32>
    %cst_33 = arith.constant 1.000000e+00 : f32
    %546 = vector.broadcast %cst_33 : f32 to vector<4x256xf32>
    %547 = arith.mulf %545, %546 : vector<4x256xf32>
    %548 = arith.addf %547, %1 : vector<4x256xf32>
    %c0_34 = arith.constant 0 : index
    %c0_35 = arith.constant 0 : index
    %c0_36 = arith.constant 0 : index
    %549 = vector.load %arg6[%c0_34, %c0_35, %c0_36] : memref<1x4x256xf32, #tpu.memory_space<vmem>>, vector<1x4x256xf32>
    %550 = vector.shape_cast %549 : vector<1x4x256xf32> to vector<4x256xf32>
    %551 = vector.shape_cast %548 : vector<4x256xf32> to vector<1x4x256xf32>
    tpu.vector_store %arg6[%c0_34, %c0_35, %c0_36], %551 {strides = array<i32>} : memref<1x4x256xf32, #tpu.memory_space<vmem>>, vector<1x4x256xf32>,
    return
  }
  func.func @transform_0(%arg0: i32) -> (i32, i32, i32) {
    %c0_i32 = arith.constant 0 : i32
    %c0_i32_0 = arith.constant 0 : i32
    %c0_i32_1 = arith.constant 0 : i32
    return %arg0, %c0_i32, %c0_i32_0 : i32, i32, i32
  }
  func.func @transform_1(%arg0: i32) -> (i32, i32) {
    %c0_i32 = arith.constant 0 : i32
    %c0_i32_0 = arith.constant 0 : i32
    %c0_i32_1 = arith.constant 0 : i32
    return %c0_i32, %c0_i32_0 : i32, i32
  }
  func.func @transform_2(%arg0: i32) -> (i32, i32) {
    %c0_i32 = arith.constant 0 : i32
    %c0_i32_0 = arith.constant 0 : i32
    %c0_i32_1 = arith.constant 0 : i32
    return %c0_i32, %c0_i32_0 : i32, i32
  }
  func.func @transform_3(%arg0: i32) -> (i32, i32) {
    %c0_i32 = arith.constant 0 : i32
    %c0_i32_0 = arith.constant 0 : i32
    %c0_i32_1 = arith.constant 0 : i32
    return %c0_i32, %c0_i32_0 : i32, i32
  }
  func.func @transform_4(%arg0: i32) -> (i32, i32) {
    %c0_i32 = arith.constant 0 : i32
    %c0_i32_0 = arith.constant 0 : i32
    %c0_i32_1 = arith.constant 0 : i32
    return %c0_i32, %c0_i32_0 : i32, i32
  }
  func.func @transform_5(%arg0: i32) -> (i32, i32, i32) {
    %c0_i32 = arith.constant 0 : i32
    %c0_i32_0 = arith.constant 0 : i32
    %c0_i32_1 = arith.constant 0 : i32
    return %arg0, %c0_i32, %c0_i32_0 : i32, i32, i32
  }
}

</mosaic_0001>

<bundles_post_ra>
// kernel: tpu_custom_call.1
= control target key start
LH: loop header
LB: loop body
LE: loop exit
PB: predicated region body
PF: predicated region fallthrough
CT: control target
= control target key end

     0   :  { %10 = vsyncpa [#allocation3], 0  ;;  %s3090_s0 = inlined_call_operand.hbm [shape: f32[2,4,256], index: 0, kind: input, shape index: {}]   ;;  %s3091_s1 = inlined_call_operand.vmem [shape: f32[4,36], index: 1, kind: input, shape index: {}]   ;;  %s3092_s2 = inlined_call_operand.vmem [shape: f32[4,1], index: 2, kind: input, shape index: {}]   ;;  %s3093_s3 = inlined_call_operand.vmem [shape: f32[4,36], index: 3, kind: input, shape index: {}]   ;;  %s3094_s4 = inlined_call_operand.vmem [shape: f32[4,1], index: 4, kind: input, shape index: {}]   ;;  %s3095_s5 = inlined_call_operand.hbm [shape: f32[2,4,256], index: 5, kind: output, shape index: {}]  }
   0x1   :  { %12 = vsyncpa [#allocation3 + $0x1], 0 }
   0x2   :  { %13 = vsyncpa [#allocation4], 0 }
   0x3   :  { %15 = vsyncpa [#allocation4 + $0x1], 0  ;;  %s2140_s18 = smov 0   ;;  %s2142_s19 = smov 0  }
   0x4   :  { %s2144_s20 = smov 0   ;;  %s2146_s21 = smov 0  }
   0x5 LB: > { %s2161_s22 = sadd.s32 4294967295, %s2061_s21   ;;  %s1785_s23 = sadd.s32 4294967294, %s2061_s21   ;;  %s2061_s21 = sphi %s2146_s21, %s3169_s21   ;;  %s2057_s20 = sphi %s2144_s20, %s3168_s20   ;;  %s2053_s19 = sphi %s2142_s19, %s3167_s19   ;;  %s2049_s18 = sphi %s2140_s18, %s3166_s18  }
   0x6   : > { %s2165_s24 = sadd.s32 1, %s2061_s21   ;;  %s28_s25 = sadd.s32 1, %s2057_s20 }
   0x7   : > { %s25_s26 = ssub.s32 %s2061_s21, %s2165_s24  ;;  %p35_p0 = scmp.ne.s32.totalorder %s2057_s20, %s2053_s19 }
   0x8   : > { %p26_p1 = scmp.eq.s32.totalorder %s25_s26, 0  ;;  %p36_p2 = scmp.eq.s32.totalorder %s2061_s21, 0 }
   0x9   : > { %p41_p3 = scmp.ne.s32.totalorder %s2053_s19, %s2049_s18  ;;  %p42_p4 = scmp.eq.s32.totalorder %s2161_s22, 0 }
   0xa   : > { %s2177_s27 = scalar_select %p26_p1, %s2057_s20, %s28_s25  }
   0xb   : > { %p2179_p5 = por %p36_p2, %p35_p0  ;;  %p2183_p6 = por %p42_p4, %p41_p3 }
   0xc   : > { %p149_p7 = scmp.eq.s32.totalorder %s2161_s22, 1  ;;  %p155_p8 = scmp.eq.s32.totalorder %s1785_s23, 1 }
   0xd   : > { %s3128_s29 = scalar_select %p2183_p6, 1, 0 }
   0xe   : > { %p1813_p10 = scmp.lt.s32.totalorder %s2061_s21, 2  ;;  %p2190_p11 = por %p149_p7, %p35_p0 }
   0xf   : > { %p2194_p12 = por %p155_p8, %p41_p3  ;;  %s187_s7 = sand.u32 1, %s2057_s20  }
  0x10   : > { %s3129_s30 = scalar_select %p2190_p11, 1, 0 }
  0x11   : > { %s3130_s6 = scalar_select %p2194_p12, 1, 0 }
  0x12   : > { %s1799_s8 = sshll.u32 %s2061_s21, 7  ;;  %s1788_s9 = sshll.u32 %s187_s7, 3 }
  0x13   : > { %s2203_s12 = scalar_lea.hbm %s3090_s0, %s1799_s8  ;;  %s191_s13 = scalar_lea.vmem [#allocation2], %s1788_s9 }
  0x14   : > { %s199_s14 = sshll.u32 %s191_s13, 4  ;;  %p2207_p13 = pnand %p1813_p10, %p2179_p5  ;;  %s2211_s14 = int_to_ptr.vmem [resolvable:$true] %s199_s14 }
  0x15   : > { %s188_s16 = scalar_lea.sflag [#allocation3], %s187_s7  ;;  %s1969_s17 = scalar_lea.hbm %s2203_s12, 128 }
  0x16   : > { %p1970_p2 = scmp.ne.s32.totalorder %s2203_s12, %s1969_s17  ;;  %p1971_p3 = pneg %p2207_p13 }
  0x17   : > { %s1974_s26 = scalar_lea.hbm %s3090_s0, 256  ;;  %p1975_p5 = scmp.lt.s32.totalorder %s2203_s12, %s3090_s0 }
  0x18   : > { %p1972_p4 = pnand %p1971_p3, %p1970_p2  ;;  %p1976_p8 = scmp.lt.s32.totalorder %s1974_s26, %s1969_s17 }
  0x1a   : > { %p1973_p7 = pneg %p1972_p4  ;;  %p1977_p10 = por %p1976_p8, %p1975_p5 }
  0x1c   : > { %p1978_p9 = pnand %p1977_p10, %p1973_p7 }
  0x1e   : > { %1981 = shalt.err (!%p1978_p9)
}
  0x1f   : > { %s1982_s7 = scalar_lea.vmem %s2211_s14, 128  ;;  %s2063_s9 = smov [#allocation2]  }
  0x20   : > { %p1983_p0 = scmp.ne.s32.totalorder %s2211_s14, %s1982_s7  ;;  %s1987_s10 = sshll.u32 %s2063_s9, 4  ;;  %s1988_s10 = int_to_ptr.vmem [resolvable:$false] %s1987_s10 }
  0x21   : > { %s1989_s11 = scalar_lea.vmem %s1988_s10, 256  ;;  %p1990_p4 = scmp.lt.s32.totalorder %s2211_s14, %s1988_s10 }
  0x22   : > { %p1985_p1 = pnand %p1983_p0, %p1971_p3  ;;  %p1991_p12 = scmp.lt.s32.totalorder %s1989_s11, %s1982_s7 }
  0x24   : > { %p1986_p2 = pneg %p1985_p1  ;;  %p1992_p11 = por %p1991_p12, %p1990_p4 }
  0x26   : > { %p1993_p6 = pnand %p1992_p11, %p1986_p2 }
  0x28   : > { %1996 = shalt.err (!%p1993_p6)
}
  0x29   : > { %1808 = dma.hbm_to_vmem [thread:$0]  (!%p2207_p13), %s2203_s12, 128, %s2211_s14, %s188_s16  }
  0x2a   : > { %p3132_p9 = scmp.lt.s32.totalorder %s2061_s21, 3  ;;  %p3133_p7 = scmp.ge.s32.totalorder %s2061_s21, 1 }
  0x2c   : > { %p205_p0 = pnand %p3133_p7, %p3132_p9 }
  0x2d   : > { %s2238_s13 = sand.u32 (!%p205_p0), 1, %s2053_s19   ;;  %p3134_p6 = scmp.ne.s32.totalorder (!%p205_p0), %s3128_s29, 0 }
  0x2e   : > { %208 = sbr.rel (%p205_p0) target bundleno = 1114 (0x45a), region = 40  ;;  %s1792_s17 = sshll.u32 (!%p205_p0), %s2238_s13, 3 }
  0x2f   : > { %s211_s23 = scalar_lea.sflag (!%p205_p0), [#allocation3], %s2238_s13  ;;  %s2244_s15 = scalar_lea.vmem (!%p205_p0), [#allocation2], %s1792_s17 }
  0x33   : > { %2040 = dma.done.wait (%p3134_p6), %s211_s23, 128  }
  0x34   : > { %2042 = vsyncadd (%p3134_p6), %s211_s23, 4294967168  ;;  %v3117_v0 = vmov 30   ;;  %v2065_v1 = vmov 28   ;;  %v2255_v2 = vld [vmem:[%s3091_s1] sm:$0xf]  ;;  %v2066_v4 = vmov 31   ;;  %v242_v19 = vlaneseq }
  0x35   : > { %1894 = vset.pattern.permute.xlu1 %v3117_v0  ;;  %1892 = vset.pattern.permute.xlu0 %v2065_v1  ;;  %v241_v3 = vld [vmem:[%s2244_s15] sm:$0xff]  ;;  %v2067_v5 = vmov 29   ;;  %s2068_s29 = smov 17   ;;  %v3118_v7 = vmov 20   ;;  %v3115_v8 = vmov 21   ;;  %v3112_v9 = vmov 22  }
  0x36   : > { %814 = vperm.xlu1 %1894, %v2255_v2   ;;  %800 = vperm.xlu0 %1892, %v2255_v2   ;;  %v2264_v6 = vcombine.high %v241_v3, %v241_v3  ;;  %v3111_v10 = vmov 24   ;;  %v3116_v11 = vmov 23   ;;  %v3109_v12 = vmov 27   ;;  %s2079_s16 = smov 110   ;;  %s2080_s25 = smov 96  }
  0x37   : > { %v3110_v13 = vmov 25   ;;  %v3108_v14 = vmov 5   ;;  %v3114_v15 = vmov 26   ;;  %v3113_v16 = vmov 4   ;;  %s2081_s26 = smov 95   ;;  %s2096_s28 = smov 126  }
  0x38   : > { %v314_v20 = vshrl.u32 %v242_v19, 7  ;;  %vm295_vm0 = vcmask 138240   ;;  %vm730_vm1 = vcmask 785408   ;;  %vm655_vm3 = vcmask 900096   ;;  %s2100_s8 = smov 112   ;;  %s2104_s7 = smov 94  }
  0x39   : > { %vm951_vm7 = vcmask 777216   ;;  %s2106_s9 = smov 127   ;;  %s2108_s10 = smov 111   ;;  %vm468_vm8 = vcmask 1031168   ;;  %vm543_vm9 = vcmask 916480   ;;  %vm842_vm10 = vcmask 769024  }
  0x3a   : > { %1895 = vset.pattern.permute.xlu1 %v2066_v4  ;;  %1893 = vset.pattern.permute.xlu0 %v2067_v5  ;;  %v2288_v23 = vsub.s32 0, %v314_v20  ;;  %v2290_v24 = vsub.s32 1, %v314_v20  ;;  %v2292_v25 = vsub.s32 2, %v314_v20  ;;  %v2294_v26 = vsub.s32 3, %v314_v20  ;;  %p3163_p12 = scmp.ne.s32.totalorder %s3129_s30, 0 }
  0x3b   : > { %821 = vperm.xlu1 %1895, %v2255_v2   ;;  %807 = vperm.xlu0 %1893, %v2255_v2   ;;  %v3101_v20 = vmov 19   ;;  %vm920_vm11 = vcmask 1039360   ;;  %vm982_vm12 = vcmask 908288  }
  0x3f   : > { %291 = vrot.lane.b32.xlu1 %v241_v3, %s2068_s29  ;;  %293 = vrot.lane.b32.xlu0 %v2264_v6, %s2068_s29 }
  0x40   : > { %1896 = vset.pattern.permute.xlu1 %v3118_v7  ;;  %1897 = vset.pattern.permute.xlu0 %v3115_v8 }
  0x43   : > { %663 = vperm.xlu1 %1896, %v2255_v2   ;;  %677 = vperm.xlu0 %1897, %v2255_v2  }
  0x47   : > { %1898 = vset.pattern.permute.xlu1 %v3112_v9  ;;  %1900 = vset.pattern.permute.xlu0 %v3111_v10 }
  0x48   : > { %691 = vperm.xlu1 %1898, %v2255_v2   ;;  %738 = vperm.xlu0 %1900, %v2255_v2  }
  0x4c   : > { %1899 = vset.pattern.permute.xlu1 %v3116_v11  ;;  %1903 = vset.pattern.permute.xlu0 %v3109_v12 }
  0x4d   : > { %705 = vperm.xlu1 %1899, %v2255_v2   ;;  %780 = vperm.xlu0 %1903, %v2255_v2  }
  0x51   : > { %1901 = vset.pattern.permute.xlu1 %v3110_v13  ;;  %1905 = vset.pattern.permute.xlu0 %v3108_v14 }
  0x52   : > { %752 = vperm.xlu1 %1901, %v2255_v2  }
  0x56   : > { %1902 = vset.pattern.permute.xlu1 %v3114_v15 }
  0x57   : > { %766 = vperm.xlu1 %1902, %v2255_v2  }
  0x5b   : > { %1904 = vset.pattern.permute.xlu1 %v3113_v16 }
  0xb1   : > { %v815_v17 = vpop.permute.xlu1 %814  ;;  %v801_v18 = vpop.permute.xlu0 %800 }
  0xb6   : > { %v822_v21 = vpop.permute.xlu1 %821  ;;  %v808_v22 = vpop.permute.xlu0 %807 }
  0xba   : > { %v292_v27 = vpop.permute.xlu1 %291  ;;  %v294_v28 = vpop.permute.xlu0 %293 }
  0xbb   : > { %v2297_v29 = vsel %vm295_vm0, 0.0, %v292_v27  ;;  %v2300_v30 = vsel %vm295_vm0, %v292_v27, %v294_v28  ;;  %v2303_v31 = vsel %vm295_vm0, %v294_v28, 0.0  ;;  %v3102_v27 = vmov 17  }
  0xbc   : > { %649 = vrot.lane.b32.xlu1 %v2297_v29, %s2079_s16  ;;  %653 = vrot.lane.b32.xlu0 %v2303_v31, %s2079_s16  ;;  %v2311_v32 = vrot.slane %v2297_v29, %v2288_v23  ;;  %v2315_v33 = vrot.slane %v2297_v29, %v2290_v24  ;;  %v2319_v34 = vrot.slane %v2297_v29, %v2292_v25  ;;  %v3098_v28 = vmov 3  }
  0xbd   : > { %v2323_v35 = vrot.slane %v2297_v29, %v2294_v26  ;;  %v2327_v36 = vrot.slane %v2303_v31, %v2288_v23  ;;  %v2331_v37 = vrot.slane %v2303_v31, %v2290_v24  ;;  %v2335_v38 = vrot.slane %v2303_v31, %v2292_v25 }
  0xbe   : > { %v803_v39 = vmul.f32 %v801_v18, %v2311_v32  ;;  %v810_v40 = vmul.f32 %v808_v22, %v2315_v33  ;;  %v817_v41 = vmul.f32 %v815_v17, %v2319_v34  ;;  %v2342_v42 = vrot.slane %v2303_v31, %v2294_v26 }
  0xbf   : > { %v824_v43 = vmul.f32 %v822_v21, %v2323_v35  ;;  %v805_v44 = vmul.f32 %v801_v18, %v2327_v36  ;;  %v812_v45 = vmul.f32 %v808_v22, %v2331_v37  ;;  %v819_v46 = vmul.f32 %v815_v17, %v2335_v38 }
  0xc0   : > { %724 = vrot.lane.b32.xlu1 %v2297_v29, %s2080_s25  ;;  %726 = vrot.lane.b32.xlu0 %v2300_v30, %s2080_s25  ;;  %v827_v47 = vadd.f32 %v810_v40, %v803_v39  ;;  %v826_v48 = vmul.f32 %v822_v21, %v2342_v42  ;;  %v2355_v49 = vrot.slane %v2300_v30, %v2288_v23  ;;  %v3105_v39 = vmov 18  }
  0xc1   : > { %v830_v50 = vadd.f32 %v824_v43, %v817_v41  ;;  %v2359_v51 = vrot.slane %v2300_v30, %v2290_v24  ;;  %v2363_v52 = vrot.slane %v2300_v30, %v2292_v25  ;;  %v829_v53 = vadd.f32 %v812_v45, %v805_v44  ;;  %v2402_v44 = vpop.permute.xlu1 %663 }
  0xc2   : > { %v2367_v54 = vrot.slane %v2300_v30, %v2294_v26  ;;  %v804_v55 = vmul.f32 %v801_v18, %v2355_v49  ;;  %v832_v57 = vadd.f32 %v826_v48, %v819_v46  ;;  %v3106_v18 = vmov 6  }
  0xc3   : > { %v833_v56 = vadd.f32 %v830_v50, %v827_v47  ;;  %v811_v58 = vmul.f32 %v808_v22, %v2359_v51  ;;  %v818_v59 = vmul.f32 %v815_v17, %v2363_v52  ;;  %v3104_v17 = vmov 16   ;;  %v2408_v47 = vpop.permute.xlu0 %677 }
  0xc4   : > { %651 = vrot.lane.b32.xlu1 %v2300_v30, %s2079_s16  ;;  %v825_v60 = vmul.f32 %v822_v21, %v2367_v54  ;;  %v835_v63 = vadd.f32 %v832_v57, %v829_v53  ;;  %v3107_v21 = vmov 7   ;;  %v3124_v22 = vmov 0  }
  0xc5   : > { %945 = vrot.lane.b32.xlu0 %v833_v56, %s2081_s26  ;;  %v828_v61 = vadd.f32 %v811_v58, %v804_v55  ;;  %v3103_v40 = vmov 1   ;;  %v3099_v41 = vmov 2   ;;  %v3100_v43 = vmov 8   ;;  %v2404_v45 = vpop.permute.xlu1 %691 }
  0xc6   : > { %v831_v62 = vadd.f32 %v825_v60, %v818_v59  ;;  %v243_v56 = vand.u32 127, %v242_v19 }
  0xc7   : > { %v2412_v50 = vpop.permute.xlu0 %738 }
  0xc8   : > { %728 = vrot.lane.b32.xlu1 %v2303_v31, %s2080_s25  ;;  %v834_v3 = vadd.f32 %v831_v62, %v828_v61  ;;  %v249_v57 = vand.u32 15, %v243_v56  ;;  %v244_v58 = vadd.s32 128, %v243_v56 }
  0xc9   : > { %949 = vrot.lane.b32.xlu0 %v835_v63, %s2081_s26  ;;  %v2406_v46 = vpop.permute.xlu1 %705 }
  0xca   : > { %v2419_v61 = vadd.s32 4294967295, %v249_v57  ;;  %v256_v62 = vand.u32 15, %v244_v58 }
  0xcb   : > { %v2416_v55 = vpop.permute.xlu0 %780 }
  0xcc   : > { %947 = vrot.lane.b32.xlu1 %v834_v3, %s2081_s26  ;;  %vm271_vm2 = vcmp.ge.s32.totalorder %v2419_v61, 0  ;;  %v2429_v56 = vadd.s32 4294967295, %v256_v62 }
  0xcd   : > { %391 = vperm.xlu0 %1905, %v2255_v2   ;;  %v2410_v48 = vpop.permute.xlu1 %752 }
  0xce   : > { %vm272_vm6 = vcmp.ge.s32.totalorder %v2429_v56, 0 }
  0xd0   : > { %372 = vperm.xlu1 %1904, %v2255_v2  }
  0xd1   : > { %1908 = vset.pattern.permute.xlu0 %v3104_v17 }
  0xd2   : > { %613 = vperm.xlu0 %1908, %v2255_v2   ;;  %v2414_v53 = vpop.permute.xlu1 %766 }
  0xd4   : > { %1906 = vset.pattern.permute.xlu1 %v3106_v18 }
  0xd5   : > { %410 = vperm.xlu1 %1906, %v2255_v2  }
  0xd6   : > { %1911 = vset.pattern.permute.xlu0 %v3101_v20 }
  0xd7   : > { %634 = vperm.xlu0 %1911, %v2255_v2  }
  0xd9   : > { %1907 = vset.pattern.permute.xlu1 %v3107_v21 }
  0xda   : > { %429 = vperm.xlu1 %1907, %v2255_v2  }
  0xdb   : > { %1912 = vset.pattern.permute.xlu0 %v3124_v22 }
  0xdc   : > { %310 = vperm.xlu0 %1912, %v2255_v2  }
  0xde   : > { %1909 = vset.pattern.permute.xlu1 %v3102_v27 }
  0xdf   : > { %620 = vperm.xlu1 %1909, %v2255_v2  }
  0xe0   : > { %1915 = vset.pattern.permute.xlu0 %v3098_v28  ;;  %v2421_v28 = vadd.s32 1, %v249_v57 }
  0xe2   : > { %vm281_vm4 = vcmp.lt.s32.totalorder %v2421_v28, 16 }
  0xe3   : > { %1910 = vset.pattern.permute.xlu1 %v3105_v39 }
  0xe4   : > { %627 = vperm.xlu1 %1910, %v2255_v2  }
  0xe8   : > { %1913 = vset.pattern.permute.xlu1 %v3103_v40 }
  0xe9   : > { %324 = vperm.xlu1 %1913, %v2255_v2  }
  0xed   : > { %1914 = vset.pattern.permute.xlu1 %v3099_v41  ;;  %v2423_v41 = vadd.s32 1, %v256_v62 }
  0xee   : > { %338 = vperm.xlu1 %1914, %v2255_v2  }
  0xef   : > { %vm282_vm5 = vcmp.lt.s32.totalorder %v2423_v41, 16 }
  0xf2   : > { %1916 = vset.pattern.permute.xlu1 %v3100_v43 }
 0x12e   : > { %v650_v59 = vpop.permute.xlu1 %649  ;;  %v654_v60 = vpop.permute.xlu0 %653 }
 0x132   : > { %v725_v63 = vpop.permute.xlu1 %724  ;;  %v727_v3 = vpop.permute.xlu0 %726 }
 0x133   : > { %v731_v43 = vsel %vm730_vm1, %v725_v63, %v727_v3 }
 0x134   : > { %v735_v19 = vsel %vm271_vm2, %v731_v43, 0.0 }
 0x135   : > { %v744_v20 = vrot.slane %v735_v19, %v2288_v23  ;;  %v758_v58 = vrot.slane %v735_v19, %v2290_v24  ;;  %v772_v27 = vrot.slane %v735_v19, %v2292_v25  ;;  %v786_v57 = vrot.slane %v735_v19, %v2294_v26 }
 0x136   : > { %v652_v40 = vpop.permute.xlu1 %651 }
 0x137   : > { %v749_v63 = vmul.f32 %v744_v20, %v2412_v50  ;;  %v763_v43 = vmul.f32 %v758_v58, %v2410_v48  ;;  %v777_v62 = vmul.f32 %v772_v27, %v2414_v53  ;;  %v791_v17 = vmul.f32 %v786_v57, %v2416_v55  ;;  %v946_v16 = vpop.permute.xlu0 %945 }
 0x138   : > { %v656_v39 = vsel %vm655_vm3, %v650_v59, %v652_v40  ;;  %v657_v18 = vsel %vm655_vm3, %v652_v40, %v654_v60 }
 0x139   : > { %v660_v19 = vsel %vm281_vm4, %v656_v39, 0.0  ;;  %v661_v21 = vsel %vm282_vm5, %v657_v18, 0.0  ;;  %v793_v14 = vadd.f32 %v763_v43, %v749_v63  ;;  %v795_v20 = vadd.f32 %v791_v17, %v777_v62 }
 0x13a   : > { %v669_v58 = vrot.slane %v660_v19, %v2288_v23  ;;  %v673_v27 = vrot.slane %v661_v21, %v2288_v23  ;;  %v683_v57 = vrot.slane %v660_v19, %v2290_v24  ;;  %v729_v12 = vpop.permute.xlu1 %728  ;;  %v687_v40 = vrot.slane %v661_v21, %v2290_v24 }
 0x13b   : > { %v697_v59 = vrot.slane %v660_v19, %v2292_v25  ;;  %v701_v60 = vrot.slane %v661_v21, %v2292_v25  ;;  %v711_v39 = vrot.slane %v660_v19, %v2294_v26  ;;  %v715_v18 = vrot.slane %v661_v21, %v2294_v26 }
 0x13c   : > { %v732_v17 = vsel %vm730_vm1, %v727_v3, %v729_v12  ;;  %v674_v63 = vmul.f32 %v669_v58, %v2402_v44  ;;  %v688_v43 = vmul.f32 %v683_v57, %v2408_v47  ;;  %v797_v9 = vadd.f32 %v795_v20, %v793_v14 }
 0x13d   : > { %v736_v62 = vsel %vm272_vm6, %v732_v17, 0.0  ;;  %v702_v13 = vmul.f32 %v697_v59, %v2404_v45  ;;  %v716_v10 = vmul.f32 %v711_v39, %v2406_v46  ;;  %v675_v17 = vmul.f32 %v673_v27, %v2402_v44 }
 0x13e   : > { %v748_v15 = vrot.slane %v736_v62, %v2288_v23  ;;  %v762_v19 = vrot.slane %v736_v62, %v2290_v24  ;;  %v776_v21 = vrot.slane %v736_v62, %v2292_v25  ;;  %v790_v12 = vrot.slane %v736_v62, %v2294_v26  ;;  %v948_v3 = vpop.permute.xlu1 %947 }
 0x13f   : > { %v952_v58 = vsel %vm951_vm7, %v946_v16, %v948_v3  ;;  %v718_v57 = vadd.f32 %v688_v43, %v674_v63  ;;  %v720_v8 = vadd.f32 %v716_v10, %v702_v13  ;;  %v689_v20 = vmul.f32 %v687_v40, %v2408_v47  ;;  %v950_v47 = vpop.permute.xlu0 %949 }
 0x140   : > { %v750_v59 = vmul.f32 %v748_v15, %v2412_v50  ;;  %v956_v14 = vadd.f32 %v952_v58, %v797_v9  ;;  %v703_v11 = vmul.f32 %v701_v60, %v2404_v45  ;;  %v764_v0 = vmul.f32 %v762_v19, %v2410_v48 }
 0x141   : > { %v722_v39 = vadd.f32 %v720_v8, %v718_v57  ;;  %v778_v7 = vmul.f32 %v776_v21, %v2414_v53  ;;  %v792_v62 = vmul.f32 %v790_v12, %v2416_v55  ;;  %v717_v16 = vmul.f32 %v715_v18, %v2406_v46 }
 0x142   : > { %962 = vrot.lane.b32.xlu0 %v956_v14, %s2068_s29  ;;  %v719_v10 = vadd.f32 %v689_v20, %v675_v17  ;;  %v794_v9 = vadd.f32 %v764_v0, %v750_v59  ;;  %v2093_v45 = vmov 10   ;;  %v953_v46 = vsel %vm951_vm7, %v948_v3, %v950_v47 }
 0x143   : > { %931 = vrot.lane.b32.xlu1 %v722_v39, %s2068_s29  ;;  %v721_v13 = vadd.f32 %v717_v16, %v703_v11  ;;  %v796_v15 = vadd.f32 %v792_v62, %v778_v7  ;;  %v3126_v0 = vmov 13   ;;  %v2095_v7 = vmov 9  }
 0x144   : > { %v3121_v50 = vmov 32   ;;  %v2098_v53 = vmov 11   ;;  %v2099_v27 = vmov 12   ;;  %v2101_v60 = vmov 14  }
 0x145   : > { %v723_v8 = vadd.f32 %v721_v13, %v719_v10  ;;  %v798_v44 = vadd.f32 %v796_v15, %v794_v9  ;;  %v3119_v43 = vmov 35   ;;  %v3122_v12 = vmov 15  }
 0x146   : > { %352 = vperm.xlu0 %1915, %v2255_v2   ;;  %v3123_v59 = vmov 33   ;;  %v3120_v39 = vmov 34  }
 0x147   : > { %933 = vrot.lane.b32.xlu1 %v723_v8, %s2068_s29  ;;  %v957_v48 = vadd.f32 %v953_v46, %v798_v44 }
 0x148   : > { %v392_v63 = vpop.permute.xlu0 %391 }
 0x149   : > { %v407_v3 = vmul.f32 %v2359_v51, %v392_v63  ;;  %v408_v8 = vmul.f32 %v2331_v37, %v392_v63 }
 0x14a   : > { %1918 = vset.pattern.permute.xlu0 %v2093_v45 }
 0x14b   : > { %476 = vperm.xlu1 %1916, %v2255_v2   ;;  %504 = vperm.xlu0 %1918, %v2255_v2   ;;  %v373_v11 = vpop.permute.xlu1 %372 }
 0x14c   : > { %v388_v19 = vmul.f32 %v2355_v49, %v373_v11  ;;  %v387_v14 = vmul.f32 %v2311_v32, %v373_v11  ;;  %v389_v10 = vmul.f32 %v2327_v36, %v373_v11 }
 0x14e   : > { %v448_v57 = vadd.f32 %v407_v3, %v388_v19  ;;  %v449_v44 = vadd.f32 %v408_v8, %v389_v10 }
 0x14f   : > { %964 = vrot.lane.b32.xlu1 %v957_v48, %s2068_s29  ;;  %1921 = vset.pattern.permute.xlu0 %v3126_v0  ;;  %v614_v48 = vpop.permute.xlu0 %613 }
 0x150   : > { %1917 = vset.pattern.permute.xlu1 %v2095_v7  ;;  %565 = vperm.xlu0 %1921, %v2255_v2   ;;  %v411_v55 = vpop.permute.xlu1 %410 }
 0x151   : > { %v426_v21 = vmul.f32 %v2363_v52, %v411_v55  ;;  %v425_v20 = vmul.f32 %v2319_v34, %v411_v55 }
 0x153   : > { %490 = vperm.xlu1 %1917, %v2255_v2   ;;  %v635_v11 = vpop.permute.xlu0 %634 }
 0x154   : > { %462 = vrot.lane.b32.xlu0 %v2297_v29, %s2096_s28  ;;  %v637_v19 = vmul.f32 %v635_v11, %v2323_v35 }
 0x155   : > { %1924 = vset.pattern.permute.xlu0 %v3121_v50  ;;  %v430_v40 = vpop.permute.xlu1 %429 }
 0x156   : > { %v445_v18 = vmul.f32 %v2367_v54, %v430_v40  ;;  %v446_v62 = vmul.f32 %v2342_v42, %v430_v40 }
 0x157   : > { %1919 = vset.pattern.permute.xlu1 %v2098_v53 }
 0x158   : > { %518 = vperm.xlu1 %1919, %v2255_v2   ;;  %466 = vrot.lane.b32.xlu0 %v2303_v31, %s2096_s28  ;;  %v451_v58 = vadd.f32 %v445_v18, %v426_v21  ;;  %v616_v21 = vmul.f32 %v614_v48, %v2311_v32  ;;  %v639_v32 = vmul.f32 %v635_v11, %v2342_v42 }
 0x15a   : > { %v454_v17 = vadd.f32 %v451_v58, %v448_v57  ;;  %v621_v46 = vpop.permute.xlu1 %620  ;;  %v2546_v58 = vpop.permute.xlu0 %310 }
 0x15b   : > { %v624_v10 = vmul.f32 %v621_v46, %v2359_v51 }
 0x15c   : > { %1920 = vset.pattern.permute.xlu1 %v2099_v27  ;;  %539 = vrot.lane.b32.xlu0 %v2300_v30, %s2100_s8 }
 0x15d   : > { %551 = vperm.xlu1 %1920, %v2255_v2  }
 0x160   : > { %850 = vperm.xlu0 %1924, %v2255_v2  }
 0x161   : > { %1922 = vset.pattern.permute.xlu1 %v2101_v60 }
 0x162   : > { %579 = vperm.xlu1 %1922, %v2255_v2  }
 0x164   : > { %1927 = vset.pattern.permute.xlu0 %v3119_v43 }
 0x165   : > { %892 = vperm.xlu0 %1927, %v2255_v2  }
 0x166   : > { %1923 = vset.pattern.permute.xlu1 %v3122_v12 }
 0x167   : > { %593 = vperm.xlu1 %1923, %v2255_v2  }
 0x169   : > { %840 = vrot.lane.b32.xlu0 %v2303_v31, %s2104_s7 }
 0x16a   : > { %1929 = vset.pattern.permute.xlu0 %v2065_v1  ;;  %v444_v1 = vmul.f32 %v2323_v35, %v430_v40  ;;  %v628_v40 = vpop.permute.xlu1 %627  ;;  %v625_v35 = vmul.f32 %v621_v46, %v2331_v37 }
 0x16b   : > { %464 = vrot.lane.b32.xlu1 %v2300_v30, %s2096_s28 }
 0x16c   : > { %1925 = vset.pattern.permute.xlu1 %v3123_v59  ;;  %v450_v16 = vadd.f32 %v444_v1, %v425_v20 }
 0x16d   : > { %916 = vrot.lane.b32.xlu0 %v454_v17, %s2106_s9 }
 0x16e   : > { %v2540_v18 = vpop.permute.xlu1 %324 }
 0x16f   : > { %537 = vrot.lane.b32.xlu1 %v2297_v29, %s2100_s8 }
 0x172   : > { %v2548_v57 = vpop.permute.xlu1 %338 }
 0x173   : > { %541 = vrot.lane.b32.xlu1 %v2303_v31, %s2100_s8  ;;  %v406_v31 = vmul.f32 %v2315_v33, %v392_v63  ;;  %v623_v63 = vmul.f32 %v621_v46, %v2315_v33  ;;  %v631_v33 = vmul.f32 %v628_v40, %v2363_v52 }
 0x175   : > { %v447_v13 = vadd.f32 %v406_v31, %v387_v14  ;;  %v640_v17 = vadd.f32 %v623_v63, %v616_v21  ;;  %v3137_v63 = vmov 23   ;;  %v3138_v21 = vmov 21  }
 0x177   : > { %864 = vperm.xlu1 %1925, %v2255_v2   ;;  %v453_v9 = vadd.f32 %v450_v16, %v447_v13  ;;  %v638_v16 = vmul.f32 %v635_v11, %v2367_v54  ;;  %v618_v13 = vmul.f32 %v614_v48, %v2327_v36  ;;  %v287_v36 = vld [vmem:[%s3092_s2] sm:$0xf] }
 0x17b   : > { %1926 = vset.pattern.permute.xlu1 %v3120_v39 }
 0x17c   : > { %878 = vperm.xlu1 %1926, %v2255_v2   ;;  %v427_v2 = vmul.f32 %v2335_v38, %v411_v55  ;;  %v630_v55 = vmul.f32 %v628_v40, %v2319_v34  ;;  %v632_v34 = vmul.f32 %v628_v40, %v2335_v38 }
 0x17e   : > { %v452_v15 = vadd.f32 %v446_v62, %v427_v2  ;;  %v643_v3 = vadd.f32 %v637_v19, %v630_v55  ;;  %v645_v8 = vadd.f32 %v639_v32, %v632_v34  ;;  %v3136_v19 = vmov 30  }
 0x180   : > { %836 = vrot.lane.b32.xlu1 %v2297_v29, %s2104_s7  ;;  %v455_v47 = vadd.f32 %v452_v15, %v449_v44  ;;  %v646_v1 = vadd.f32 %v643_v3, %v640_v17  ;;  %v644_v15 = vadd.f32 %v638_v16, %v631_v33  ;;  %v642_v44 = vadd.f32 %v625_v35, %v618_v13 }
 0x181   : > { %1928 = vset.pattern.permute.xlu1 %v3124_v22 }
 0x182   : > { %v648_v52 = vadd.f32 %v645_v8, %v642_v44 }
 0x184   : > { %838 = vrot.lane.b32.xlu1 %v2300_v30, %s2104_s7 }
 0x188   : > { %914 = vrot.lane.b32.xlu1 %v453_v9, %s2106_s9  ;;  %v617_v9 = vmul.f32 %v614_v48, %v2355_v49  ;;  %v2571_v49 = vld [vmem:[%s3093_s3] sm:$0xf]  ;;  %v3135_v48 = vmov 20  }
 0x18c   : > { %918 = vrot.lane.b32.xlu1 %v455_v47, %s2106_s9  ;;  %v641_v47 = vadd.f32 %v624_v10, %v617_v9  ;;  %v306_v9 = vsel %vm271_vm2, %v2297_v29, 0.0 }
 0x18d   : > { %v330_v44 = vrot.slane %v306_v9, %v2290_v24 }
 0x18e   : > { %v647_v40 = vadd.f32 %v644_v15, %v641_v47  ;;  %v307_v15 = vsel %vm272_vm6, %v2300_v30, 0.0 }
 0x18f   : > { %v320_v30 = vrot.slane %v307_v15, %v2288_v23 }
 0x1b4   : > { %v963_v20 = vpop.permute.xlu0 %962 }
 0x1b5   : > { %v932_v14 = vpop.permute.xlu1 %931 }
 0x1b6   : > { %v939_v31 = vadd.f32 %v932_v14, %v646_v1 }
 0x1b8   : > { %v970_v62 = vadd.f32 %v963_v20, %v939_v31 }
 0x1b9   : > { %v934_v2 = vpop.permute.xlu1 %933 }
 0x1ba   : > { %976 = vrot.lane.b32.xlu0 %v970_v62, %s2108_s10  ;;  %v935_v42 = vsel %vm295_vm0, %v932_v14, %v934_v2  ;;  %v941_v37 = vadd.f32 %v934_v2, %v648_v52  ;;  %v316_v52 = vrot.slane %v306_v9, %v2288_v23 }
 0x1bb   : > { %v940_v55 = vadd.f32 %v935_v42, %v647_v40  ;;  %v334_v42 = vrot.slane %v307_v15, %v2290_v24  ;;  %v335_v40 = vmul.f32 %v330_v44, %v2540_v18 }
 0x1c6   : > { %v2559_v38 = vpop.permute.xlu1 %476 }
 0x1ca   : > { %v965_v54 = vpop.permute.xlu1 %964 }
 0x1cb   : > { %v966_v51 = vsel %vm295_vm0, %v963_v20, %v965_v54  ;;  %v972_v46 = vadd.f32 %v965_v54, %v941_v37  ;;  %v353_v20 = vpop.permute.xlu0 %352  ;;  %v358_v37 = vrot.slane %v306_v9, %v2294_v26 }
 0x1cc   : > { %v971_v11 = vadd.f32 %v966_v51, %v940_v55  ;;  %v336_v51 = vmul.f32 %v334_v42, %v2540_v18 }
 0x1cd   : > { %980 = vrot.lane.b32.xlu0 %v972_v46, %s2108_s10 }
 0x1ce   : > { %978 = vrot.lane.b32.xlu1 %v971_v11, %s2108_s10  ;;  %v2588_v3 = vpop.permute.xlu1 %490  ;;  %v321_v11 = vmul.f32 %v316_v52, %v2546_v58 }
 0x1cf   : > { %v2598_v62 = vpop.permute.xlu0 %504 }
 0x1d0   : > { %v365_v18 = vadd.f32 %v335_v40, %v321_v11 }
 0x1d1   : > { %1498 = vperm.xlu0 %1929, %v2571_v49  }
 0x1d2   : > { %993 = vperm.xlu1 %1928, %v287_v36   ;;  %v344_v36 = vrot.slane %v306_v9, %v2292_v25 }
 0x1d3   : > { %v2590_v17 = vpop.permute.xlu1 %518  ;;  %v2600_v33 = vpop.permute.xlu0 %565 }
 0x1d5   : > { %1932 = vset.pattern.permute.xlu0 %v2066_v4  ;;  %v3139_v4 = vmov 26  }
 0x1d6   : > { %1930 = vset.pattern.permute.xlu1 %v2067_v5  ;;  %1519 = vperm.xlu0 %1932, %v2571_v49   ;;  %v3140_v5 = vmov 4  }
 0x1d7   : > { %1505 = vperm.xlu1 %1930, %v2571_v49   ;;  %v463_v35 = vpop.permute.xlu0 %462 }
 0x1d8   : > { %v2592_v1 = vpop.permute.xlu1 %551 }
 0x1da   : > { %1933 = vset.pattern.permute.xlu0 %v3135_v48  ;;  %v363_v48 = vmul.f32 %v358_v37, %v353_v20 }
 0x1db   : > { %1931 = vset.pattern.permute.xlu1 %v3136_v19  ;;  %1362 = vperm.xlu0 %1933, %v2571_v49   ;;  %v467_v10 = vpop.permute.xlu0 %466 }
 0x1dc   : > { %1512 = vperm.xlu1 %1931, %v2571_v49  }
 0x1dd   : > { %v2594_v14 = vpop.permute.xlu1 %579 }
 0x1df   : > { %1936 = vset.pattern.permute.xlu0 %v3137_v63  ;;  %v540_v13 = vpop.permute.xlu0 %539  ;;  %v322_v63 = vmul.f32 %v320_v30, %v2546_v58 }
 0x1e0   : > { %1934 = vset.pattern.permute.xlu1 %v3138_v21  ;;  %1404 = vperm.xlu0 %1936, %v2571_v49   ;;  %v348_v21 = vrot.slane %v307_v15, %v2292_v25 }
 0x1e2   : > { %v2596_v31 = vpop.permute.xlu1 %593  ;;  %v350_v58 = vmul.f32 %v348_v21, %v2548_v57 }
 0x1e3   : > { %v2613_v47 = vpop.permute.xlu0 %850 }
 0x1e4   : > { %1939 = vset.pattern.permute.xlu0 %v3139_v4 }
 0x1e5   : > { %1464 = vperm.xlu0 %1939, %v2571_v49  }
 0x1e6   : > { %v465_v34 = vpop.permute.xlu1 %464 }
 0x1e7   : > { %v469_v29 = vsel %vm468_vm8, %v463_v35, %v465_v34  ;;  %v470_v46 = vsel %vm468_vm8, %v465_v34, %v467_v10  ;;  %v349_v34 = vmul.f32 %v344_v36, %v2548_v57  ;;  %v2635_v35 = vpop.permute.xlu0 %892  ;;  %v2639_v10 = vadd.f32 %v336_v51, %v322_v63 }
 0x1e8   : > { %v473_v4 = vsel %vm281_vm4, %v469_v29, 0.0 }
 0x1e9   : > { %1941 = vset.pattern.permute.xlu0 %v3140_v5  ;;  %v367_v44 = vadd.f32 %v363_v48, %v349_v34  ;;  %v482_v52 = vrot.slane %v473_v4, %v2288_v23  ;;  %v496_v57 = vrot.slane %v473_v4, %v2290_v24  ;;  %v510_v30 = vrot.slane %v473_v4, %v2292_v25 }
 0x1ea   : > { %v538_v32 = vpop.permute.xlu1 %537 }
 0x1eb   : > { %v544_v55 = vsel %vm543_vm9, %v538_v32, %v540_v13  ;;  %v362_v32 = vrot.slane %v307_v15, %v2294_v26  ;;  %v501_v50 = vmul.f32 %v496_v57, %v2588_v3 }
 0x1ec   : > { %v548_v5 = vsel %vm271_vm2, %v544_v55, 0.0 }
 0x1ed   : > { %v364_v9 = vmul.f32 %v362_v32, %v353_v20  ;;  %v557_v42 = vrot.slane %v548_v5, %v2288_v23  ;;  %v571_v37 = vrot.slane %v548_v5, %v2290_v24  ;;  %v585_v29 = vrot.slane %v548_v5, %v2292_v25 }
 0x1ee   : > { %v542_v16 = vpop.permute.xlu1 %541  ;;  %v599_v55 = vrot.slane %v548_v5, %v2294_v26  ;;  %v524_v20 = vrot.slane %v473_v4, %v2294_v26  ;;  %v841_v5 = vpop.permute.xlu0 %840 }
 0x1ef   : > { %v545_v19 = vsel %vm543_vm9, %v540_v13, %v542_v16  ;;  %v474_v16 = vsel %vm282_vm5, %v470_v46, 0.0  ;;  %v562_v4 = vmul.f32 %v557_v42, %v2592_v1  ;;  %v576_v34 = vmul.f32 %v571_v37, %v2600_v33 }
 0x1f0   : > { %v549_v13 = vsel %vm272_vm6, %v545_v19, 0.0  ;;  %v486_v40 = vrot.slane %v474_v16, %v2288_v23  ;;  %v500_v46 = vrot.slane %v474_v16, %v2290_v24  ;;  %v487_v19 = vmul.f32 %v482_v52, %v2559_v38 }
 0x1f1   : > { %v561_v51 = vrot.slane %v549_v13, %v2288_v23  ;;  %v575_v11 = vrot.slane %v549_v13, %v2290_v24  ;;  %v589_v36 = vrot.slane %v549_v13, %v2292_v25  ;;  %v603_v48 = vrot.slane %v549_v13, %v2294_v26 }
 0x1f2   : > { %v2602_v2 = vpop.permute.xlu1 %864  ;;  %v514_v63 = vrot.slane %v474_v16, %v2292_v25  ;;  %v528_v21 = vrot.slane %v474_v16, %v2294_v26  ;;  %v590_v32 = vmul.f32 %v585_v29, %v2594_v14  ;;  %v604_v43 = vmul.f32 %v599_v55, %v2596_v31 }
 0x1f3   : > { %v515_v13 = vmul.f32 %v510_v30, %v2598_v62  ;;  %v529_v52 = vmul.f32 %v524_v20, %v2590_v17  ;;  %v563_v12 = vmul.f32 %v561_v51, %v2592_v1  ;;  %v577_v59 = vmul.f32 %v575_v11, %v2600_v33 }
 0x1f4   : > { %v591_v42 = vmul.f32 %v589_v36, %v2594_v14  ;;  %v605_v37 = vmul.f32 %v603_v48, %v2596_v31  ;;  %v488_v55 = vmul.f32 %v486_v40, %v2559_v38  ;;  %v516_v30 = vmul.f32 %v514_v63, %v2598_v62  ;;  %v917_v14 = vpop.permute.xlu0 %916 }
 0x1f5   : > { %v530_v1 = vmul.f32 %v528_v21, %v2590_v17  ;;  %v606_v20 = vadd.f32 %v576_v34, %v562_v4  ;;  %v608_v33 = vadd.f32 %v604_v43, %v590_v32  ;;  %v368_v51 = vadd.f32 %v364_v9, %v350_v58 }
 0x1f6   : > { %v531_v11 = vadd.f32 %v501_v50, %v487_v19  ;;  %v607_v40 = vadd.f32 %v577_v59, %v563_v12 }
 0x1f7   : > { %v2604_v8 = vpop.permute.xlu1 %878  ;;  %v534_v48 = vadd.f32 %v530_v1, %v516_v30  ;;  %v370_v59 = vadd.f32 %v368_v51, %v2639_v10 }
 0x1fb   : > { %v837_v54 = vpop.permute.xlu1 %836 }
 0x1ff   : > { %v839_v15 = vpop.permute.xlu1 %838 }
 0x200   : > { %v843_v39 = vsel %vm842_vm10, %v837_v54, %v839_v15  ;;  %v844_v29 = vsel %vm842_vm10, %v839_v15, %v841_v5  ;;  %v502_v54 = vmul.f32 %v500_v46, %v2588_v3  ;;  %v369_v15 = vadd.f32 %v367_v44, %v365_v18 }
 0x201   : > { %v847_v57 = vsel %vm281_vm4, %v843_v39, 0.0  ;;  %v848_v31 = vsel %vm282_vm5, %v844_v29, 0.0  ;;  %v533_v3 = vadd.f32 %v529_v52, %v515_v13  ;;  %v609_v46 = vadd.f32 %v605_v37, %v591_v42 }
 0x202   : > { %v856_v38 = vrot.slane %v847_v57, %v2288_v23  ;;  %v870_v39 = vrot.slane %v847_v57, %v2290_v24  ;;  %v884_v62 = vrot.slane %v847_v57, %v2292_v25  ;;  %v898_v17 = vrot.slane %v847_v57, %v2294_v26 }
 0x203   : > { %v915_v16 = vpop.permute.xlu1 %914  ;;  %v532_v43 = vadd.f32 %v502_v54, %v488_v55  ;;  %v860_v58 = vrot.slane %v848_v31, %v2288_v23  ;;  %v610_v18 = vadd.f32 %v608_v33, %v606_v20  ;;  %v874_v50 = vrot.slane %v848_v31, %v2290_v24 }
 0x204   : > { %v921_v9 = vsel %vm920_vm11, %v915_v16, %v917_v14  ;;  %v888_v44 = vrot.slane %v848_v31, %v2292_v25  ;;  %v902_v12 = vrot.slane %v848_v31, %v2294_v26  ;;  %v861_v63 = vmul.f32 %v856_v38, %v2613_v47 }
 0x205   : > { %v535_v5 = vadd.f32 %v533_v3, %v531_v11  ;;  %v611_v4 = vadd.f32 %v609_v46, %v607_v40  ;;  %v875_v34 = vmul.f32 %v870_v39, %v2602_v2  ;;  %v889_v32 = vmul.f32 %v884_v62, %v2604_v8 }
 0x206   : > { %v903_v13 = vmul.f32 %v898_v17, %v2635_v35  ;;  %v925_v52 = vadd.f32 %v921_v9, %v369_v15  ;;  %v862_v42 = vmul.f32 %v860_v58, %v2613_v47  ;;  %v536_v37 = vadd.f32 %v534_v48, %v532_v43 }
 0x207   : > { %v919_v36 = vpop.permute.xlu1 %918  ;;  %v927_v29 = vadd.f32 %v610_v18, %v535_v5  ;;  %v876_v10 = vmul.f32 %v874_v50, %v2602_v2  ;;  %v890_v55 = vmul.f32 %v888_v44, %v2604_v8  ;;  %v904_v54 = vmul.f32 %v902_v12, %v2635_v35 }
 0x208   : > { %v922_v21 = vsel %vm920_vm11, %v917_v14, %v919_v36  ;;  %v928_v20 = vadd.f32 %v611_v4, %v536_v37  ;;  %v905_v51 = vadd.f32 %v875_v34, %v861_v63  ;;  %v907_v14 = vadd.f32 %v903_v13, %v889_v32 }
 0x209   : > { %v926_v57 = vadd.f32 %v922_v21, %v370_v59  ;;  %v958_v33 = vadd.f32 %v927_v29, %v925_v52  ;;  %v906_v11 = vadd.f32 %v876_v10, %v862_v42  ;;  %v908_v38 = vadd.f32 %v904_v54, %v890_v55 }
 0x20a   : > { %v909_v2 = vadd.f32 %v907_v14, %v905_v51  ;;  %v3141_v43 = vmov 22   ;;  %v3142_v58 = vmov 24   ;;  %v3143_v9 = vmov 25  }
 0x20b   : > { %v959_v15 = vadd.f32 %v928_v20, %v926_v57  ;;  %v910_v40 = vadd.f32 %v908_v38, %v906_v11  ;;  %v3144_v48 = vmov 27   ;;  %v3145_v18 = vmov 5  }
 0x22c   : > { %v977_v19 = vpop.permute.xlu0 %976 }
 0x23f   : > { %v981_v30 = vpop.permute.xlu0 %980 }
 0x240   : > { %v979_v16 = vpop.permute.xlu1 %978 }
 0x241   : > { %v983_v1 = vsel %vm982_vm12, %v977_v19, %v979_v16  ;;  %v984_v31 = vsel %vm982_vm12, %v979_v16, %v981_v30 }
 0x242   : > { %v987_v47 = vadd.f32 %v983_v1, %v958_v33  ;;  %v988_v3 = vadd.f32 %v984_v31, %v959_v15 }
 0x244   : > { %v989_v8 = vadd.f32 %v987_v47, %v909_v2  ;;  %v990_v35 = vadd.f32 %v988_v3, %v910_v40 }
 0x24c   : > { %v1499_v12 = vpop.permute.xlu0 %1498 }
 0x24d   : > { %v994_v46 = vpop.permute.xlu1 %993 }
 0x24e   : > { %v996_v39 = vadd.f32 %v994_v46, %v989_v8  ;;  %v997_v62 = vadd.f32 %v994_v46, %v990_v35 }
 0x250   : > { %v998_v17 = vmax.f32 %v996_v39, 0.0  ;;  %v999_v36 = vmax.f32 %v997_v62, 0.0 }
 0x251   : > { %v1520_v63 = vpop.permute.xlu0 %1519 }
 0x252   : > { %1002 = vrot.lane.b32.xlu1 %v998_v17, %s2068_s29  ;;  %v1506_v50 = vpop.permute.xlu1 %1505 }
 0x256   : > { %1004 = vrot.lane.b32.xlu1 %v999_v36, %s2068_s29 }
 0x257   : > { %v1513_v44 = vpop.permute.xlu1 %1512 }
 0x25a   : > { %1376 = vperm.xlu1 %1934, %v2571_v49  }
 0x25e   : > { %1935 = vset.pattern.permute.xlu1 %v3141_v43  ;;  %v3146_v43 = vmov 7  }
 0x25f   : > { %1390 = vperm.xlu1 %1935, %v2571_v49  }
 0x263   : > { %1937 = vset.pattern.permute.xlu1 %v3142_v58  ;;  %v3147_v58 = vmov 6  }
 0x264   : > { %1436 = vperm.xlu1 %1937, %v2571_v49  }
 0x268   : > { %1938 = vset.pattern.permute.xlu1 %v3143_v9  ;;  %v3148_v9 = vmov 18  }
 0x269   : > { %1450 = vperm.xlu1 %1938, %v2571_v49  }
 0x26d   : > { %1940 = vset.pattern.permute.xlu1 %v3144_v48  ;;  %v3149_v48 = vmov 16  }
 0x26e   : > { %1478 = vperm.xlu1 %1940, %v2571_v49  }
 0x272   : > { %1942 = vset.pattern.permute.xlu1 %v3145_v18  ;;  %v3150_v18 = vmov 1  }
 0x2c4   : > { %v1003_v59 = vpop.permute.xlu1 %1002 }
 0x2c5   : > { %v2716_v19 = vsel %vm295_vm0, 0.0, %v1003_v59 }
 0x2c6   : > { %1349 = vrot.lane.b32.xlu1 %v2716_v19, %s2079_s16  ;;  %v2722_v21 = vrot.slane %v2716_v19, %v2292_v25  ;;  %v2726_v5 = vrot.slane %v2716_v19, %v2294_v26  ;;  %v2730_v4 = vrot.slane %v2716_v19, %v2288_v23  ;;  %v2734_v34 = vrot.slane %v2716_v19, %v2290_v24 }
 0x2c8   : > { %v1515_v32 = vmul.f32 %v1513_v44, %v2722_v21  ;;  %v1522_v13 = vmul.f32 %v1520_v63, %v2726_v5  ;;  %v1005_v52 = vpop.permute.xlu1 %1004  ;;  %v1501_v16 = vmul.f32 %v1499_v12, %v2730_v4  ;;  %v1508_v42 = vmul.f32 %v1506_v50, %v2734_v34 }
 0x2c9   : > { %v2741_v37 = vsel %vm295_vm0, %v1003_v59, %v1005_v52  ;;  %v2744_v29 = vsel %vm295_vm0, %v1005_v52, 0.0  ;;  %v3154_v59 = vmov 2  }
 0x2ca   : > { %v1528_v10 = vadd.f32 %v1522_v13, %v1515_v32  ;;  %1353 = vrot.lane.b32.xlu1 %v2744_v29, %s2079_s16  ;;  %1351 = vrot.lane.b32.xlu0 %v2741_v37, %s2079_s16  ;;  %v2752_v55 = vrot.slane %v2741_v37, %v2288_v23  ;;  %v2756_v54 = vrot.slane %v2741_v37, %v2290_v24 }
 0x2cb   : > { %v2760_v57 = vrot.slane %v2741_v37, %v2292_v25  ;;  %v2764_v30 = vrot.slane %v2741_v37, %v2294_v26  ;;  %v2768_v1 = vrot.slane %v2744_v29, %v2288_v23  ;;  %v1525_v20 = vadd.f32 %v1508_v42, %v1501_v16  ;;  %v1363_v16 = vpop.permute.xlu0 %1362 }
 0x2cc   : > { %v1502_v33 = vmul.f32 %v1499_v12, %v2752_v55  ;;  %v2773_v51 = vrot.slane %v2744_v29, %v2290_v24  ;;  %v2777_v14 = vrot.slane %v2744_v29, %v2292_v25  ;;  %v1509_v31 = vmul.f32 %v1506_v50, %v2756_v54 }
 0x2cd   : > { %v1516_v15 = vmul.f32 %v1513_v44, %v2760_v57  ;;  %v1523_v47 = vmul.f32 %v1520_v63, %v2764_v30  ;;  %v2784_v11 = vrot.slane %v2744_v29, %v2294_v26  ;;  %v1503_v38 = vmul.f32 %v1499_v12, %v2768_v1 }
 0x2ce   : > { %1425 = vrot.lane.b32.xlu1 %v2741_v37, %s2080_s25  ;;  %1423 = vrot.lane.b32.xlu0 %v2716_v19, %s2080_s25  ;;  %v1510_v3 = vmul.f32 %v1506_v50, %v2773_v51  ;;  %v1517_v2 = vmul.f32 %v1513_v44, %v2777_v14  ;;  %v1531_v8 = vadd.f32 %v1528_v10, %v1525_v20  ;;  %v3151_v50 = vmov 17  }
 0x2cf   : > { %v1524_v40 = vmul.f32 %v1520_v63, %v2784_v11  ;;  %v1526_v46 = vadd.f32 %v1509_v31, %v1502_v33  ;;  %v1529_v35 = vadd.f32 %v1523_v47, %v1516_v15  ;;  %v3152_v44 = vmov 19   ;;  %v1405_v10 = vpop.permute.xlu0 %1404 }
 0x2d0   : > { %v1527_v39 = vadd.f32 %v1510_v3, %v1503_v38  ;;  %v3153_v12 = vmov 8   ;;  %v3155_v63 = vmov 3  }
 0x2d1   : > { %v1530_v62 = vadd.f32 %v1524_v40, %v1517_v2  ;;  %v1532_v17 = vadd.f32 %v1529_v35, %v1526_v46 }
 0x2d2   : > { %1427 = vrot.lane.b32.xlu0 %v2744_v29, %s2080_s25  ;;  %1641 = vrot.lane.b32.xlu1 %v1531_v8, %s2081_s26  ;;  %s1800_s25 = sshll.u32 %s2161_s22, 7  ;;  %s2109_s22 = smov [#allocation5]  }
 0x2d3   : > { %v1533_v36 = vadd.f32 %v1530_v62, %v1527_v39  ;;  %v1465_v33 = vpop.permute.xlu0 %1464 }
 0x2d5   : > { %v1377_v32 = vpop.permute.xlu1 %1376 }
 0x2d6   : > { %1643 = vrot.lane.b32.xlu0 %v1532_v17, %s2081_s26  ;;  %1645 = vrot.lane.b32.xlu1 %v1533_v36, %s2081_s26  ;;  %s240_s26 = scalar_lea.vmem [#allocation5], %s1792_s17  ;;  %s2001_s17 = sshll.u32 %s2109_s22, 4  ;;  %s2002_s17 = int_to_ptr.vmem [resolvable:$false] %s2001_s17 }
 0x2da   : > { %1078 = vperm.xlu0 %1941, %v2571_v49   ;;  %1097 = vperm.xlu1 %1942, %v2571_v49   ;;  %v1391_v13 = vpop.permute.xlu1 %1390 }
 0x2de   : > { %1944 = vset.pattern.permute.xlu0 %v3146_v43  ;;  %1943 = vset.pattern.permute.xlu1 %v3147_v58 }
 0x2df   : > { %1135 = vperm.xlu0 %1944, %v2571_v49   ;;  %1116 = vperm.xlu1 %1943, %v2571_v49   ;;  %v1437_v52 = vpop.permute.xlu1 %1436 }
 0x2e3   : > { %1947 = vset.pattern.permute.xlu0 %v3148_v9  ;;  %1945 = vset.pattern.permute.xlu1 %v3149_v48 }
 0x2e4   : > { %1327 = vperm.xlu0 %1947, %v2571_v49   ;;  %1313 = vperm.xlu1 %1945, %v2571_v49   ;;  %v1451_v42 = vpop.permute.xlu1 %1450 }
 0x2e8   : > { %1950 = vset.pattern.permute.xlu0 %v3150_v18  ;;  %1946 = vset.pattern.permute.xlu1 %v3151_v50 }
 0x2e9   : > { %1030 = vperm.xlu0 %1950, %v2571_v49   ;;  %1320 = vperm.xlu1 %1946, %v2571_v49   ;;  %v1479_v20 = vpop.permute.xlu1 %1478 }
 0x2ed   : > { %1948 = vset.pattern.permute.xlu1 %v3152_v44  ;;  %1953 = vset.pattern.permute.xlu0 %v3153_v12 }
 0x2ee   : > { %1334 = vperm.xlu1 %1948, %v2571_v49  }
 0x2f2   : > { %1949 = vset.pattern.permute.xlu1 %v3124_v22 }
 0x2f3   : > { %1016 = vperm.xlu1 %1949, %v2571_v49  }
 0x2f7   : > { %1951 = vset.pattern.permute.xlu1 %v3154_v59 }
 0x2f8   : > { %1044 = vperm.xlu1 %1951, %v2571_v49  }
 0x2fc   : > { %1952 = vset.pattern.permute.xlu1 %v3155_v63 }
 0x2fd   : > { %1058 = vperm.xlu1 %1952, %v2571_v49  }
 0x301   : > { %1954 = vset.pattern.permute.xlu1 %v2095_v7 }
 0x338   : > { %v1350_v31 = vpop.permute.xlu1 %1349 }
 0x33c   : > { %v1354_v15 = vpop.permute.xlu1 %1353  ;;  %v1352_v47 = vpop.permute.xlu0 %1351 }
 0x33d   : > { %v1355_v38 = vsel %vm655_vm3, %v1350_v31, %v1352_v47  ;;  %v1356_v3 = vsel %vm655_vm3, %v1352_v47, %v1354_v15 }
 0x33e   : > { %v1359_v2 = vsel %vm281_vm4, %v1355_v38, 0.0  ;;  %v1360_v7 = vsel %vm282_vm5, %v1356_v3, 0.0 }
 0x33f   : > { %v1368_v40 = vrot.slane %v1359_v2, %v2288_v23  ;;  %v1372_v8 = vrot.slane %v1360_v7, %v2288_v23  ;;  %v1382_v46 = vrot.slane %v1359_v2, %v2290_v24  ;;  %v1386_v35 = vrot.slane %v1360_v7, %v2290_v24 }
 0x340   : > { %v1396_v39 = vrot.slane %v1359_v2, %v2292_v25  ;;  %v1400_v62 = vrot.slane %v1360_v7, %v2292_v25  ;;  %v1410_v17 = vrot.slane %v1359_v2, %v2294_v26  ;;  %v1414_v36 = vrot.slane %v1360_v7, %v2294_v26  ;;  %v1426_v43 = vpop.permute.xlu1 %1425  ;;  %v1424_v58 = vpop.permute.xlu0 %1423 }
 0x341   : > { %v1373_v9 = vmul.f32 %v1368_v40, %v1363_v16  ;;  %v1387_v48 = vmul.f32 %v1382_v46, %v1377_v32  ;;  %v1429_v18 = vsel %vm730_vm1, %v1424_v58, %v1426_v43  ;;  %v1374_v50 = vmul.f32 %v1372_v8, %v1363_v16 }
 0x342   : > { %v1401_v44 = vmul.f32 %v1396_v39, %v1391_v13  ;;  %v1415_v12 = vmul.f32 %v1410_v17, %v1405_v10  ;;  %v1433_v59 = vsel %vm271_vm2, %v1429_v18, 0.0  ;;  %v1388_v63 = vmul.f32 %v1386_v35, %v1377_v32 }
 0x343   : > { %v1442_v31 = vrot.slane %v1433_v59, %v2288_v23  ;;  %v1456_v15 = vrot.slane %v1433_v59, %v2290_v24  ;;  %v1470_v47 = vrot.slane %v1433_v59, %v2292_v25  ;;  %v1484_v38 = vrot.slane %v1433_v59, %v2294_v26 }
 0x344   : > { %v1428_v3 = vpop.permute.xlu0 %1427  ;;  %v1402_v2 = vmul.f32 %v1400_v62, %v1391_v13  ;;  %v1416_v7 = vmul.f32 %v1414_v36, %v1405_v10  ;;  %v1418_v40 = vadd.f32 %v1388_v63, %v1374_v50  ;;  %v1417_v46 = vadd.f32 %v1387_v48, %v1373_v9  ;;  %v1642_v16 = vpop.permute.xlu1 %1641 }
 0x345   : > { %v1430_v8 = vsel %vm730_vm1, %v1426_v43, %v1428_v3  ;;  %v1419_v39 = vadd.f32 %v1415_v12, %v1401_v44  ;;  %v1447_v17 = vmul.f32 %v1442_v31, %v1437_v52  ;;  %v1461_v58 = vmul.f32 %v1456_v15, %v1451_v42 }
 0x346   : > { %v1434_v32 = vsel %vm272_vm6, %v1430_v8, 0.0  ;;  %v1420_v35 = vadd.f32 %v1416_v7, %v1402_v2  ;;  %v1475_v18 = vmul.f32 %v1470_v47, %v1465_v33  ;;  %v1489_v22 = vmul.f32 %v1484_v38, %v1479_v20 }
 0x347   : > { %v1446_v0 = vrot.slane %v1434_v32, %v2288_v23  ;;  %v1460_v59 = vrot.slane %v1434_v32, %v2290_v24  ;;  %v1474_v13 = vrot.slane %v1434_v32, %v2292_v25  ;;  %v1488_v10 = vrot.slane %v1434_v32, %v2294_v26 }
 0x348   : > { %v1422_v62 = vadd.f32 %v1420_v35, %v1418_v40  ;;  %v1421_v36 = vadd.f32 %v1419_v39, %v1417_v46  ;;  %v1491_v43 = vadd.f32 %v1461_v58, %v1447_v17  ;;  %v1493_v9 = vadd.f32 %v1489_v22, %v1475_v18  ;;  %v1644_v48 = vpop.permute.xlu0 %1643  ;;  %v1646_v47 = vpop.permute.xlu1 %1645 }
 0x349   : > { %v1448_v50 = vmul.f32 %v1446_v0, %v1437_v52  ;;  %v1462_v44 = vmul.f32 %v1460_v59, %v1451_v42  ;;  %v1476_v12 = vmul.f32 %v1474_v13, %v1465_v33  ;;  %v1490_v63 = vmul.f32 %v1488_v10, %v1479_v20 }
 0x34a   : > { %1629 = vrot.lane.b32.xlu0 %v1422_v62, %s2068_s29  ;;  %1627 = vrot.lane.b32.xlu1 %v1421_v36, %s2068_s29  ;;  %v1495_v31 = vadd.f32 %v1493_v9, %v1491_v43  ;;  %v1647_v15 = vsel %vm951_vm7, %v1642_v16, %v1644_v48  ;;  %v1648_v40 = vsel %vm951_vm7, %v1644_v48, %v1646_v47  ;;  %v3156_v20 = vmov 13  }
 0x34b   : > { %v1492_v38 = vadd.f32 %v1462_v44, %v1448_v50  ;;  %v1494_v3 = vadd.f32 %v1490_v63, %v1476_v12  ;;  %v3158_v33 = vmov 15   ;;  %v3159_v16 = vmov 32  }
 0x34c   : > { %v1651_v2 = vadd.f32 %v1647_v15, %v1495_v31  ;;  %v1012_v32 = vsel %vm271_vm2, %v2716_v19, 0.0  ;;  %v1013_v59 = vsel %vm272_vm6, %v2741_v37, 0.0  ;;  %v3160_v36 = vmov 0  }
 0x34d   : > { %v1496_v7 = vadd.f32 %v1494_v3, %v1492_v38  ;;  %v1022_v62 = vrot.slane %v1012_v32, %v2288_v23  ;;  %v1036_v43 = vrot.slane %v1012_v32, %v2290_v24  ;;  %v1026_v48 = vrot.slane %v1013_v59, %v2288_v23 }
 0x34e   : > { %1657 = vrot.lane.b32.xlu1 %v1651_v2, %s2068_s29  ;;  %v1040_v44 = vrot.slane %v1013_v59, %v2290_v24  ;;  %v1050_v63 = vrot.slane %v1012_v32, %v2292_v25  ;;  %v1064_v15 = vrot.slane %v1012_v32, %v2294_v26  ;;  %v1068_v47 = vrot.slane %v1013_v59, %v2294_v26 }
 0x34f   : > { %v1652_v22 = vadd.f32 %v1648_v40, %v1496_v7 }
 0x351   : > { %1659 = vrot.lane.b32.xlu0 %v1652_v22, %s2068_s29 }
 0x352   : > { %1191 = vperm.xlu1 %1954, %v2571_v49  }
 0x355   : > { %v2858_v0 = vpop.permute.xlu1 %1097  ;;  %1177 = vperm.xlu0 %1953, %v2571_v49  }
 0x356   : > { %1955 = vset.pattern.permute.xlu1 %v2093_v45  ;;  %v2875_v45 = vpop.permute.xlu0 %1078  ;;  %v1113_v35 = vmul.f32 %v2756_v54, %v2858_v0 }
 0x357   : > { %1205 = vperm.xlu1 %1955, %v2571_v49   ;;  %v1094_v18 = vmul.f32 %v2752_v55, %v2875_v45 }
 0x359   : > { %1956 = vset.pattern.permute.xlu0 %v2098_v53  ;;  %v1154_v50 = vadd.f32 %v1113_v35, %v1094_v18 }
 0x35a   : > { %v2864_v52 = vpop.permute.xlu1 %1116  ;;  %1219 = vperm.xlu0 %1956, %v2571_v49  }
 0x35b   : > { %1957 = vset.pattern.permute.xlu1 %v2099_v27  ;;  %v3157_v27 = vmov 33   ;;  %v1132_v17 = vmul.f32 %v2760_v57, %v2864_v52  ;;  %v1131_v35 = vmul.f32 %v2722_v21, %v2864_v52 }
 0x35c   : > { %1251 = vperm.xlu1 %1957, %v2571_v49  }
 0x35e   : > { %1959 = vset.pattern.permute.xlu0 %v2101_v60  ;;  %v1136_v60 = vpop.permute.xlu0 %1135 }
 0x35f   : > { %v2870_v42 = vpop.permute.xlu1 %1313  ;;  %1279 = vperm.xlu0 %1959, %v2571_v49   ;;  %v1151_v58 = vmul.f32 %v2764_v30, %v1136_v60  ;;  %v1150_v18 = vmul.f32 %v2726_v5, %v1136_v60 }
 0x360   : > { %1958 = vset.pattern.permute.xlu1 %v3156_v20 }
 0x361   : > { %1265 = vperm.xlu1 %1958, %v2571_v49   ;;  %v1157_v10 = vadd.f32 %v1151_v58, %v1132_v17 }
 0x362   : > { %v2895_v39 = vpop.permute.xlu0 %1327 }
 0x363   : > { %1166 = vrot.lane.b32.xlu0 %v2741_v37, %s2096_s28  ;;  %v1160_v7 = vadd.f32 %v1157_v10, %v1154_v50  ;;  %v1093_v10 = vmul.f32 %v2730_v4, %v2875_v45  ;;  %v1095_v50 = vmul.f32 %v2768_v1, %v2875_v45  ;;  %v1330_v45 = vmul.f32 %v2895_v39, %v2722_v21 }
 0x364   : > { %v2879_v53 = vpop.permute.xlu1 %1320  ;;  %1962 = vset.pattern.permute.xlu0 %v3157_v27  ;;  %v1331_v21 = vmul.f32 %v2895_v39, %v2760_v57 }
 0x365   : > { %1960 = vset.pattern.permute.xlu1 %v3158_v33 }
 0x366   : > { %1293 = vperm.xlu1 %1960, %v2571_v49   ;;  %v1031_v9 = vpop.permute.xlu0 %1030 }
 0x367   : > { %1238 = vrot.lane.b32.xlu0 %v2716_v19, %s2100_s8  ;;  %v1041_v38 = vmul.f32 %v1036_v43, %v1031_v9  ;;  %v1042_v3 = vmul.f32 %v1040_v44, %v1031_v9  ;;  %v1152_v43 = vmul.f32 %v2784_v11, %v1136_v60  ;;  %v1156_v9 = vadd.f32 %v1150_v18, %v1131_v35 }
 0x368   : > { %v1323_v60 = vmul.f32 %v2879_v53, %v2734_v34 }
 0x369   : > { %v2886_v46 = vpop.permute.xlu1 %1334 }
 0x36a   : > { %1164 = vrot.lane.b32.xlu1 %v2716_v19, %s2096_s28 }
 0x36b   : > { %1242 = vrot.lane.b32.xlu0 %v2744_v29, %s2100_s8  ;;  %1961 = vset.pattern.permute.xlu1 %v3159_v16  ;;  %v3161_v16 = vmov 34  }
 0x36e   : > { %1168 = vrot.lane.b32.xlu1 %v2744_v29, %s2096_s28  ;;  %v1017_v8 = vpop.permute.xlu1 %1016  ;;  %s1715_s28 = sshll.u32 %s240_s26, 4  ;;  %s1716_s28 = int_to_ptr.vmem [resolvable:$true] %s1715_s28 }
 0x36f   : > { %1561 = vperm.xlu0 %1962, %v2571_v49   ;;  %v1027_v12 = vmul.f32 %v1022_v62, %v1017_v8  ;;  %v1028_v31 = vmul.f32 %v1026_v48, %v1017_v8  ;;  %v1133_v62 = vmul.f32 %v2777_v14, %v2864_v52  ;;  %v1114_v48 = vmul.f32 %v2773_v51, %v2858_v0  ;;  %s1997_s11 = scalar_lea.vmem %s1716_s28, 128  ;;  %p2004_p3 = scmp.lt.s32.totalorder %s1716_s28, %s2002_s17 }
 0x370   : > { %p1998_p11 = scmp.ne.s32.totalorder %s1716_s28, %s1997_s11 }
 0x371   : > { %v1071_v33 = vadd.f32 %v1041_v38, %v1027_v12  ;;  %v1072_v8 = vadd.f32 %v1042_v3, %v1028_v31  ;;  %v1158_v12 = vadd.f32 %v1152_v43, %v1133_v62  ;;  %v1338_v31 = vmul.f32 %v2886_v46, %v2764_v30 }
 0x372   : > { %1240 = vrot.lane.b32.xlu1 %v2741_v37, %s2100_s8  ;;  %v1317_v30 = vmul.f32 %v2870_v42, %v2752_v55  ;;  %p1999_p13 = pnand %p1998_p11, %p3163_p12 }
 0x373   : > { %v1045_v13 = vpop.permute.xlu1 %1044  ;;  %1534 = vrot.lane.b32.xlu0 %v2716_v19, %s2104_s7  ;;  %v1054_v19 = vrot.slane %v1013_v59, %v2292_v25  ;;  %v3162_v59 = vmov 35  }
 0x374   : > { %1966 = vset.pattern.permute.xlu0 %v3160_v36  ;;  %v1055_v40 = vmul.f32 %v1050_v63, %v1045_v13  ;;  %v1155_v63 = vadd.f32 %v1114_v48, %v1095_v50  ;;  %p2000_p1 = pneg %p1999_p13 }
 0x375   : > { %v1056_v22 = vmul.f32 %v1054_v19, %v1045_v13  ;;  %v1112_v13 = vmul.f32 %v2734_v34, %v2858_v0  ;;  %v1337_v0 = vmul.f32 %v2886_v46, %v2726_v5  ;;  %v1325_v5 = vmul.f32 %v2879_v53, %v2773_v51 }
 0x376   : > { %1547 = vperm.xlu1 %1961, %v2571_v49   ;;  %v1161_v52 = vadd.f32 %v1158_v12, %v1155_v63  ;;  %v1324_v34 = vmul.f32 %v2879_v53, %v2756_v54 }
 0x377   : > { %1538 = vrot.lane.b32.xlu0 %v2744_v29, %s2104_s7  ;;  %v1153_v44 = vadd.f32 %v1112_v13, %v1093_v10  ;;  %v1343_v19 = vadd.f32 %v1337_v0, %v1330_v45 }
 0x378   : > { %v1059_v2 = vpop.permute.xlu1 %1058  ;;  %v1341_v51 = vadd.f32 %v1324_v34, %v1317_v30 }
 0x379   : > { %v1069_v20 = vmul.f32 %v1064_v15, %v1059_v2  ;;  %v1070_v27 = vmul.f32 %v1068_v47, %v1059_v2  ;;  %v1332_v15 = vmul.f32 %v2895_v39, %v2777_v14 }
 0x37a   : > { %1963 = vset.pattern.permute.xlu1 %v3161_v16 }
 0x37b   : > { %v1073_v17 = vadd.f32 %v1069_v20, %v1055_v40  ;;  %v1074_v58 = vadd.f32 %v1070_v27, %v1056_v22  ;;  %1575 = vperm.xlu1 %1963, %v2571_v49   ;;  %1613 = vrot.lane.b32.xlu0 %v1160_v7, %s2106_s9 }
 0x37d   : > { %v2930_v29 = vadd.f32 %v1073_v17, %v1071_v33  ;;  %v2932_v32 = vadd.f32 %v1074_v58, %v1072_v8  ;;  %v288_v33 = vld [vmem:[%s3094_s4] sm:$0xf] }
 0x37f   : > { %1964 = vset.pattern.permute.xlu1 %v3162_v59 }
 0x380   : > { %1589 = vperm.xlu1 %1964, %v2571_v49   ;;  %v1159_v49 = vadd.f32 %v1156_v9, %v1153_v44 }
 0x384   : > { %1536 = vrot.lane.b32.xlu1 %v2741_v37, %s2104_s7  ;;  %v1339_v37 = vmul.f32 %v2886_v46, %v2784_v11  ;;  %v1344_v46 = vadd.f32 %v1338_v31, %v1331_v21 }
 0x385   : > { %1965 = vset.pattern.permute.xlu1 %v3160_v36  ;;  %v1316_v36 = vmul.f32 %v2870_v42, %v2730_v4  ;;  %v1318_v4 = vmul.f32 %v2870_v42, %v2768_v1 }
 0x386   : > { %v1345_v47 = vadd.f32 %v1339_v37, %v1332_v15  ;;  %v1347_v54 = vadd.f32 %v1344_v46, %v1341_v51 }
 0x387   : > { %v1340_v11 = vadd.f32 %v1323_v60, %v1316_v36  ;;  %v1342_v2 = vadd.f32 %v1325_v5, %v1318_v4 }
 0x388   : > { %1611 = vrot.lane.b32.xlu1 %v1159_v49, %s2106_s9 }
 0x389   : > { %v1346_v14 = vadd.f32 %v1343_v19, %v1340_v11  ;;  %v1348_v40 = vadd.f32 %v1345_v47, %v1342_v2 }
 0x38c   : > { %1615 = vrot.lane.b32.xlu1 %v1161_v52, %s2106_s9  ;;  %s1713_s9 = scalar_lea.hbm %s3095_s5, %s1800_s25 }
 0x3bc   : > { %v1628_v38 = vpop.permute.xlu1 %1627  ;;  %v1630_v3 = vpop.permute.xlu0 %1629 }
 0x3bd   : > { %v1635_v7 = vadd.f32 %v1628_v38, %v1346_v14  ;;  %v1631_v57 = vsel %vm295_vm0, %v1628_v38, %v1630_v3  ;;  %v1637_v22 = vadd.f32 %v1630_v3, %v1348_v40 }
 0x3be   : > { %v1636_v20 = vadd.f32 %v1631_v57, %v1347_v54 }
 0x3c0   : > { %v1658_v39 = vpop.permute.xlu1 %1657 }
 0x3c1   : > { %v1665_v53 = vadd.f32 %v1658_v39, %v1635_v7 }
 0x3c3   : > { %1671 = vrot.lane.b32.xlu0 %v1665_v53, %s2108_s10  ;;  %v1660_v1 = vpop.permute.xlu0 %1659 }
 0x3c4   : > { %v1661_v27 = vsel %vm295_vm0, %v1658_v39, %v1660_v1  ;;  %v1667_v55 = vadd.f32 %v1660_v1, %v1637_v22 }
 0x3c5   : > { %v1666_v42 = vadd.f32 %v1661_v27, %v1636_v20 }
 0x3c7   : > { %1675 = vrot.lane.b32.xlu0 %v1667_v55, %s2108_s10  ;;  %1673 = vrot.lane.b32.xlu1 %v1666_v42, %s2108_s10  ;;  %s1701_s10 = scalar_lea.sflag [#allocation4], %s2238_s13 }
 0x3cb   : > { %1687 = vperm.xlu1 %1965, %v288_v33  }
 0x3cd   : > { %v1192_v16 = vpop.permute.xlu1 %1191 }
 0x3d0   : > { %v1178_v58 = vpop.permute.xlu0 %1177 }
 0x3d2   : > { %v1206_v8 = vpop.permute.xlu1 %1205 }
 0x3d5   : > { %v1220_v18 = vpop.permute.xlu0 %1219 }
 0x3d7   : > { %v1252_v17 = vpop.permute.xlu1 %1251 }
 0x3da   : > { %v1280_v13 = vpop.permute.xlu0 %1279 }
 0x3dc   : > { %v1266_v35 = vpop.permute.xlu1 %1265 }
 0x3de   : > { %v1167_v62 = vpop.permute.xlu0 %1166 }
 0x3e1   : > { %v1294_v59 = vpop.permute.xlu1 %1293 }
 0x3e2   : > { %v1239_v9 = vpop.permute.xlu0 %1238 }
 0x3e5   : > { %v1165_v10 = vpop.permute.xlu1 %1164 }
 0x3e6   : > { %v1243_v44 = vpop.permute.xlu0 %1242  ;;  %v1170_v63 = vsel %vm468_vm8, %v1165_v10, %v1167_v62 }
 0x3e7   : > { %v1174_v0 = vsel %vm281_vm4, %v1170_v63, 0.0 }
 0x3e8   : > { %v1183_v36 = vrot.slane %v1174_v0, %v2288_v23  ;;  %v1197_v31 = vrot.slane %v1174_v0, %v2290_v24  ;;  %v1211_v5 = vrot.slane %v1174_v0, %v2292_v25  ;;  %v1225_v11 = vrot.slane %v1174_v0, %v2294_v26 }
 0x3e9   : > { %v1169_v43 = vpop.permute.xlu1 %1168 }
 0x3ea   : > { %v2991_v49 = vpop.permute.xlu0 %1561  ;;  %v1171_v45 = vsel %vm468_vm8, %v1167_v62, %v1169_v43  ;;  %v1188_v30 = vmul.f32 %v1183_v36, %v1178_v58  ;;  %v1202_v46 = vmul.f32 %v1197_v31, %v1192_v16  ;;  %v1216_v53 = vmul.f32 %v1211_v5, %v1206_v8 }
 0x3eb   : > { %v1175_v19 = vsel %vm282_vm5, %v1171_v45, 0.0  ;;  %v1230_v22 = vmul.f32 %v1225_v11, %v1220_v18 }
 0x3ec   : > { %v1187_v4 = vrot.slane %v1175_v19, %v2288_v23  ;;  %v1201_v47 = vrot.slane %v1175_v19, %v2290_v24  ;;  %v1215_v14 = vrot.slane %v1175_v19, %v2292_v25  ;;  %v1229_v3 = vrot.slane %v1175_v19, %v2294_v26 }
 0x3ed   : > { %v1241_v48 = vpop.permute.xlu1 %1240 }
 0x3ee   : > { %v1535_v60 = vpop.permute.xlu0 %1534  ;;  %v1244_v37 = vsel %vm543_vm9, %v1239_v9, %v1241_v48  ;;  %v1245_v15 = vsel %vm543_vm9, %v1241_v48, %v1243_v44  ;;  %v1189_v20 = vmul.f32 %v1187_v4, %v1178_v58  ;;  %v1203_v1 = vmul.f32 %v1201_v47, %v1192_v16 }
 0x3ef   : > { %v1248_v21 = vsel %vm271_vm2, %v1244_v37, 0.0  ;;  %v1249_v38 = vsel %vm272_vm6, %v1245_v15, 0.0  ;;  %v1217_v27 = vmul.f32 %v1215_v14, %v1206_v8  ;;  %v1231_v55 = vmul.f32 %v1229_v3, %v1220_v18 }
 0x3f0   : > { %v1257_v61 = vrot.slane %v1248_v21, %v2288_v23  ;;  %v1271_v51 = vrot.slane %v1248_v21, %v2290_v24  ;;  %v1285_v7 = vrot.slane %v1248_v21, %v2292_v25  ;;  %v1299_v40 = vrot.slane %v1248_v21, %v2294_v26 }
 0x3f1   : > { %v2987_v50 = vpop.permute.xlu1 %1547  ;;  %v1261_v57 = vrot.slane %v1249_v38, %v2288_v23  ;;  %v1275_v56 = vrot.slane %v1249_v38, %v2290_v24  ;;  %v1289_v39 = vrot.slane %v1249_v38, %v2292_v25  ;;  %v1303_v54 = vrot.slane %v1249_v38, %v2294_v26 }
 0x3f2   : > { %v1539_v2 = vpop.permute.xlu0 %1538  ;;  %v1262_v62 = vmul.f32 %v1257_v61, %v1252_v17  ;;  %v1276_v43 = vmul.f32 %v1271_v51, %v1266_v35  ;;  %v1290_v9 = vmul.f32 %v1285_v7, %v1280_v13  ;;  %v1304_v48 = vmul.f32 %v1299_v40, %v1294_v59 }
 0x3f3   : > { %v1263_v44 = vmul.f32 %v1261_v57, %v1252_v17  ;;  %v1277_v63 = vmul.f32 %v1275_v56, %v1266_v35  ;;  %v1291_v0 = vmul.f32 %v1289_v39, %v1280_v13  ;;  %v1305_v45 = vmul.f32 %v1303_v54, %v1294_v59 }
 0x3f4   : > { %v1232_v8 = vadd.f32 %v1202_v46, %v1188_v30  ;;  %v1234_v18 = vadd.f32 %v1230_v22, %v1216_v53  ;;  %v1235_v36 = vadd.f32 %v1231_v55, %v1217_v27  ;;  %v1306_v31 = vadd.f32 %v1276_v43, %v1262_v62 }
 0x3f5   : > { %v1308_v19 = vadd.f32 %v1304_v48, %v1290_v9  ;;  %v1307_v59 = vadd.f32 %v1277_v63, %v1263_v44  ;;  %v1309_v5 = vadd.f32 %v1305_v45, %v1291_v0  ;;  %v1968_v48 = vld [vmem:[%s2244_s15] sm:$0xff]  ;;  %s2003_s15 = scalar_lea.vmem %s2002_s17, 256 }
 0x3f6   : > { %v2989_v12 = vpop.permute.xlu1 %1575  ;;  %v1614_v37 = vpop.permute.xlu0 %1613  ;;  %v1236_v38 = vadd.f32 %v1234_v18, %v1232_v8  ;;  %p2005_p5 = scmp.lt.s32.totalorder %s2003_s15, %s1997_s11 }
 0x3f7   : > { %v1310_v30 = vadd.f32 %v1308_v19, %v1306_v31  ;;  %v1311_v14 = vadd.f32 %v1309_v5, %v1307_v59 }
 0x3f8   : > { %p2006_p8 = por %p2005_p5, %p2004_p3 }
 0x3f9   : > { %v1623_v54 = vadd.f32 %v1310_v30, %v1236_v38 }
 0x3fa   : > { %p2007_p10 = pnand %p2006_p8, %p2000_p1 }
 0x3fb   : > { %v2994_v52 = vpop.permute.xlu1 %1589 }
 0x3ff   : > { %v1537_v34 = vpop.permute.xlu1 %1536 }
 0x400   : > { %v1540_v42 = vsel %vm842_vm10, %v1535_v60, %v1537_v34  ;;  %v1541_v33 = vsel %vm842_vm10, %v1537_v34, %v1539_v2  ;;  %v1233_v60 = vadd.f32 %v1203_v1, %v1189_v20 }
 0x401   : > { %v1544_v58 = vsel %vm281_vm4, %v1540_v42, 0.0  ;;  %v1545_v16 = vsel %vm282_vm5, %v1541_v33, 0.0 }
 0x402   : > { %v1553_v15 = vrot.slane %v1544_v58, %v2288_v23  ;;  %v1557_v17 = vrot.slane %v1545_v16, %v2288_v23  ;;  %v1567_v28 = vrot.slane %v1544_v58, %v2290_v24  ;;  %v1571_v21 = vrot.slane %v1545_v16, %v2290_v24 }
 0x403   : > { %v1612_v10 = vpop.permute.xlu1 %1611  ;;  %v1581_v41 = vrot.slane %v1544_v58, %v2292_v25  ;;  %v1585_v34 = vrot.slane %v1545_v16, %v2292_v25  ;;  %v1595_v11 = vrot.slane %v1544_v58, %v2294_v26  ;;  %v1599_v4 = vrot.slane %v1545_v16, %v2294_v26 }
 0x404   : > { %v1617_v47 = vsel %vm920_vm11, %v1612_v10, %v1614_v37  ;;  %v1237_v46 = vadd.f32 %v1235_v36, %v1233_v60  ;;  %v1558_v3 = vmul.f32 %v1553_v15, %v2987_v50  ;;  %v1559_v24 = vmul.f32 %v1557_v17, %v2987_v50 }
 0x405   : > { %v1621_v2 = vadd.f32 %v1617_v47, %v2930_v29  ;;  %v1572_v25 = vmul.f32 %v1567_v28, %v2991_v49  ;;  %v1573_v61 = vmul.f32 %v1571_v21, %v2991_v49  ;;  %v1586_v26 = vmul.f32 %v1581_v41, %v2989_v12 }
 0x406   : > { %v1587_v57 = vmul.f32 %v1585_v34, %v2989_v12  ;;  %v1600_v56 = vmul.f32 %v1595_v11, %v2994_v52  ;;  %v1601_v39 = vmul.f32 %v1599_v4, %v2994_v52  ;;  %v1624_v50 = vadd.f32 %v1311_v14, %v1237_v46 }
 0x407   : > { %v1616_v35 = vpop.permute.xlu1 %1615  ;;  %v1653_v53 = vadd.f32 %v1623_v54, %v1621_v2  ;;  %v1602_v22 = vadd.f32 %v1572_v25, %v1558_v3 }
 0x408   : > { %v1618_v23 = vsel %vm920_vm11, %v1614_v37, %v1616_v35  ;;  %v1604_v1 = vadd.f32 %v1600_v56, %v1586_v26  ;;  %v1605_v27 = vadd.f32 %v1601_v39, %v1587_v57 }
 0x409   : > { %v1622_v51 = vadd.f32 %v1618_v23, %v2932_v32  ;;  %v1603_v32 = vadd.f32 %v1573_v61, %v1559_v24 }
 0x40a   : > { %v1606_v42 = vadd.f32 %v1604_v1, %v1602_v22 }
 0x40b   : > { %v1654_v20 = vadd.f32 %v1624_v50, %v1622_v51  ;;  %v1607_v33 = vadd.f32 %v1605_v27, %v1603_v32 }
 0x435   : > { %v1672_v13 = vpop.permute.xlu0 %1671 }
 0x439   : > { %v1676_v7 = vpop.permute.xlu0 %1675  ;;  %v1674_v40 = vpop.permute.xlu1 %1673 }
 0x43a   : > { %v1677_v29 = vsel %vm982_vm12, %v1672_v13, %v1674_v40  ;;  %v1678_v49 = vsel %vm982_vm12, %v1674_v40, %v1676_v7 }
 0x43b   : > { %v1681_v12 = vadd.f32 %v1677_v29, %v1653_v53  ;;  %v1682_v55 = vadd.f32 %v1678_v49, %v1654_v20 }
 0x43d   : > { %v1683_v52 = vadd.f32 %v1681_v12, %v1606_v42  ;;  %v1684_v10 = vadd.f32 %v1682_v55, %v1607_v33 }
 0x446   : > { %v1688_v62 = vpop.permute.xlu1 %1687 }
 0x447   : > { %v1690_v43 = vadd.f32 %v1688_v62, %v1683_v52  ;;  %v1691_v9 = vadd.f32 %v1688_v62, %v1684_v10 }
 0x449   : > { %v1693_v44 = vadd.f32 %v1968_v48, %v1690_v43  ;;  %v1694_v63 = vadd.f32 %v1691_v9, %v2264_v6 }
 0x44b   : > { %v1697_v0 = vcombine.low %v1693_v44, %v1694_v63 }
 0x44d   : > { %1699 = vst [vmem:[%s240_s26] sm:$0xff] %v1697_v0 }
 0x44e   : > { %2010 = shalt.err (!%p2007_p10)
}
 0x44f   : > { %s2011_s23 = scalar_lea.hbm %s1713_s9, 128  ;;  %s2015_s14 = scalar_lea.hbm %s3095_s5, 256 }
 0x450   : > { %p2012_p2 = scmp.ne.s32.totalorder %s1713_s9, %s2011_s23  ;;  %p2016_p7 = scmp.lt.s32.totalorder %s1713_s9, %s3095_s5 }
 0x451   : > { %p2017_p0 = scmp.lt.s32.totalorder %s2015_s14, %s2011_s23 }
 0x452   : > { %p2013_p4 = pnand %p2012_p2, %p3163_p12 }
 0x453   : > { %p2018_p6 = por %p2017_p0, %p2016_p7 }
 0x454   : > { %p2014_p9 = pneg %p2013_p4 }
 0x456   : > { %p2019_p11 = pnand %p2018_p6, %p2014_p9 }
 0x458   : > { %2022 = shalt.err (!%p2019_p11)
}
 0x459   : > { %1803 = dma.vmem_to_hbm [thread:$0]  (%p3163_p12), %s1716_s28, 128, %s1713_s9, %s1701_s10  }
 0x45a PF: > { %s1727_s25 = sand.u32 1, %s2049_s18   ;;  %p3164_p13 = scmp.ne.s32.totalorder %s3130_s6, 0 }
 0x45b   : > { %p3165_p1 = scmp.ge.s32.totalorder %s2061_s21, 2  ;;  %s1728_s26 = scalar_lea.sflag [#allocation4], %s1727_s25 }
 0x45d   : > { %p1810_p3 = pnand %p3165_p1, %p3164_p13 }
 0x45f   : > { %p1811_p5 = pneg %p1810_p3 }
 0x461   : > { %2044 = dma.done.wait (%p1811_p5), %s1728_s26, 128  }
 0x462   : > { %2046 = vsyncadd (%p1811_p5), %s1728_s26, 4294967168  ;;  %p18_p8 = scmp.ge.s32.totalorder %s2165_s24, 4   ;;  %s3166_s18 = smov %s2053_s19 }
 0x463   : > { %s3167_s19 = smov %s2057_s20  ;;  %s3168_s20 = smov %s2177_s27 }
 0x464   : > { %s3169_s21 = smov %s2165_s24  ;;  %20 = sbr.rel (!%p18_p8) target bundleno = 5 (0x5), region = 85 }
 0x469   :  { %1733 = vsyncpa [#allocation3], 1 }
 0x46a   :  { %1735 = vsyncpa [#allocation3 + $0x1], 1 }
 0x46b   :  { %1736 = vsyncpa [#allocation4], 1 }
 0x46c   :  { %1738 = vsyncpa [#allocation4 + $0x1], 1 }

</bundles_post_ra>
